<compile_context>
chip_gen: v7x
topology: tpu7x:2x2x1
jax: 0.10.0
libtpu: 0.0.40
codegen_flags: <defaults>
</compile_context>

<pallas_src>
import jax
import jax.numpy as jnp
import numpy as np
from jax.experimental import pallas as pl
from jax.experimental.pallas import tpu as pltpu


# -----------------------------------------------------------------------------
# Helpers
# -----------------------------------------------------------------------------
def _round_up(v, m):
    return (v + m - 1) // m * m


def _vmem_capacity_bytes():
    """Physical VMEM per TensorCore; conservative fallback (v7x = 64 MiB)."""
    try:
        return int(pltpu.get_tpu_info().vmem_capacity_bytes)
    except Exception:
        return 64 << 20


def _vmem_limit(need_bytes, cap_bytes):
    """Scoped-VMEM limit derived from the working set (+headroom), clamped to HW."""
    limit = max(int(1.5 * need_bytes) + (8 << 20), 32 << 20)
    ceiling = max(cap_bytes - (8 << 20), 32 << 20)
    return int(min(limit, ceiling, 112 << 20))


def _fused_vmem_bytes(Np, Fp, Hp):
    f = 4
    adj = 2 * Np * Np * f                                        # single-buffered scratch
    dbuf = 2 * (Np * Fp + Np * Hp + Fp * 2 * Hp + Hp * 2 * Hp + 2 * Hp) * f
    temps = 4 * Np * 2 * Hp * f                                  # s, h, t, y intermediates
    return adj + dbuf + temps


def _tiled_vmem_bytes(Np, Fp, Hp, TM):
    f = 4
    s = Np * 2 * Hp * f                                          # persistent x @ [W1|W2]
    dbuf = 2 * (2 * TM * Np + Np * max(Fp, Hp) + Fp * 2 * Hp
                + Hp + TM * Hp + TM * Fp) * f
    temps = 2 * TM * Hp * f
    return s + dbuf + temps


# -----------------------------------------------------------------------------
# Kernels
# -----------------------------------------------------------------------------
def _gresblock_fused_kernel(a0_hbm, a1_hbm, wa_ref, ba_ref, wb_ref, bb_ref, x_ref,
                            o_ref, a0_v, a1_v, sem):
    """Whole GResBlock for one graph per grid step (adjacency resident in VMEM).

    a0_hbm/a1_hbm : (Np, Np)   raw refs (memory_space=ANY), DMA'd once at step 0
    wa_ref        : (Fp, 2*Hp) [W1a | W2a]   (resident, constant index)
    ba_ref        : (1, Hp)
    wb_ref        : (Hp, 2*Hp) [W1b | W2b]
    bb_ref        : (1, Hp)
    x_ref         : (1, Np, Fp) node features of graph b
    o_ref         : (1, Np, Hp)
    a0_v/a1_v     : (Np, Np)   VMEM scratch — single-buffered adjacency copies
    """
    @pl.when(pl.program_id(0) == 0)
    def _():
        c0 = pltpu.make_async_copy(a0_hbm, a0_v, sem.at[0])
        c1 = pltpu.make_async_copy(a1_hbm, a1_v, sem.at[1])
        c0.start()
        c1.start()
        c0.wait()
        c1.wait()

    hp = o_ref.shape[-1]
    x = x_ref[0]                                   # (Np, Fp)
    a0 = a0_v[...]
    a1 = a1_v[...]

    # conv1: adj0 @ (x W1a) + adj1 @ (x W2a) + b_a — no restack, two accumulating dots.
    s = jnp.dot(x, wa_ref[...], preferred_element_type=jnp.float32)      # (Np, 2*Hp)
    h = (jnp.dot(a0, s[:, :hp], preferred_element_type=jnp.float32)
         + jnp.dot(a1, s[:, hp:], preferred_element_type=jnp.float32)
         + ba_ref[...])

    # conv2
    t = jnp.dot(h, wb_ref[...], preferred_element_type=jnp.float32)      # (Np, 2*Hp)
    y = (jnp.dot(a0, t[:, :hp], preferred_element_type=jnp.float32)
         + jnp.dot(a1, t[:, hp:], preferred_element_type=jnp.float32)
         + bb_ref[...])

    o_ref[0] = ((x + y) * 0.5).astype(o_ref.dtype)


def _gcn_tiled_kernel(a0_ref, a1_ref, xin_ref, w_ref, b_ref, o_ref, s_ref):
    """One (graph b, row-tile r) step of a GraphConvolution with streamed adjacency.

    a0_ref/a1_ref : (TM, Np)    adjacency row tiles (streamed, double-buffered)
    xin_ref       : (1, Np, Fp) full input of graph b (resident across r)
    w_ref         : (Fp, 2*Hp)  [W1 | W2]
    b_ref         : (1, Hp)
    o_ref         : (1, TM, Hp) output row tile
    s_ref         : (Np, 2*Hp)  persistent scratch: x @ [W1|W2], computed at r == 0
    """
    hp = o_ref.shape[-1]

    @pl.when(pl.program_id(1) == 0)
    def _():
        s_ref[...] = jnp.dot(xin_ref[0], w_ref[...], preferred_element_type=jnp.float32)

    s = s_ref[...]
    o_ref[0] = (jnp.dot(a0_ref[...], s[:, :hp], preferred_element_type=jnp.float32)
                + jnp.dot(a1_ref[...], s[:, hp:], preferred_element_type=jnp.float32)
                + b_ref[...]).astype(o_ref.dtype)


def _gcn_res_tiled_kernel(a0_ref, a1_ref, hin_ref, w_ref, b_ref, xres_ref, o_ref, s_ref):
    """Second GraphConvolution fused with the residual: out = (x + conv2(h)) * 0.5."""
    hp = o_ref.shape[-1]

    @pl.when(pl.program_id(1) == 0)
    def _():
        s_ref[...] = jnp.dot(hin_ref[0], w_ref[...], preferred_element_type=jnp.float32)

    s = s_ref[...]
    y = (jnp.dot(a0_ref[...], s[:, :hp], preferred_element_type=jnp.float32)
         + jnp.dot(a1_ref[...], s[:, hp:], preferred_element_type=jnp.float32)
         + b_ref[...])
    o_ref[0] = ((xres_ref[0] + y) * 0.5).astype(o_ref.dtype)


# -----------------------------------------------------------------------------
# Forward paths
# -----------------------------------------------------------------------------
def _fused_forward(p, xp, B):
    Np, Fp, Hp = p["Np"], p["Fp"], p["Hp"]
    cap = _vmem_capacity_bytes()
    need = _fused_vmem_bytes(Np, Fp, Hp)

    flops = B * (8 * Np * Fp * Hp + 8 * Np * Np * Hp)
    bytes_acc = 4 * (2 * Np * Np + Fp * 2 * Hp + Hp * 2 * Hp + 4 * Hp
                     + B * Np * Fp + B * Np * Hp)

    def const_spec(shape):
        return pl.BlockSpec(shape, lambda b, _n=len(shape): (0,) * _n)

    return pl.pallas_call(
        _gresblock_fused_kernel,
        out_shape=jax.ShapeDtypeStruct((B, Np, Hp), jnp.float32),
        grid_spec=pltpu.PrefetchScalarGridSpec(
            num_scalar_prefetch=0,
            grid=(B,),
            in_specs=[
                pl.BlockSpec(memory_space=pl.ANY),            # adj0 (DMA'd once)
                pl.BlockSpec(memory_space=pl.ANY),            # adj1 (DMA'd once)
                const_spec((Fp, 2 * Hp)),                     # [W1a | W2a]
                const_spec((1, Hp)),                          # bias a
                const_spec((Hp, 2 * Hp)),                     # [W1b | W2b]
                const_spec((1, Hp)),                          # bias b
                pl.BlockSpec((1, Np, Fp), lambda b: (b, 0, 0)),
            ],
            out_specs=pl.BlockSpec((1, Np, Hp), lambda b: (b, 0, 0)),
            scratch_shapes=[
                pltpu.VMEM((Np, Np), jnp.float32),            # adj0 resident (single buf)
                pltpu.VMEM((Np, Np), jnp.float32),            # adj1 resident (single buf)
                pltpu.SemaphoreType.DMA((2,)),
            ],
        ),
        compiler_params=pltpu.CompilerParams(
            # "arbitrary": the one-time adjacency DMA is gated on program_id(0)==0,
            # which must execute before later batch steps on the same core.
            dimension_semantics=("arbitrary",),
            vmem_limit_bytes=_vmem_limit(need, cap),
        ),
        cost_estimate=pl.CostEstimate(flops=flops, transcendentals=0,
                                      bytes_accessed=bytes_acc),
    )(p["a0"], p["a1"], p["wa"], p["ba"], p["wb"], p["bb"], xp)


def _tiled_forward(p, xp, B):
    Np, Fp, Hp = p["Np"], p["Fp"], p["Hp"]
    TM = 256 if Np % 256 == 0 else 128
    R = Np // TM
    cap = _vmem_capacity_bytes()
    need = _tiled_vmem_bytes(Np, Fp, Hp, TM)

    cparams = pltpu.CompilerParams(
        dimension_semantics=("parallel", "arbitrary"),
        vmem_limit_bytes=_vmem_limit(need, cap),
    )
    adj_spec = pl.BlockSpec((TM, Np), lambda b, r: (r, 0))
    bias_spec = pl.BlockSpec((1, Hp), lambda b, r: (0, 0))

    def w_spec(k):
        return pl.BlockSpec((k, 2 * Hp), lambda b, r: (0, 0))

    def full_spec(d):
        return pl.BlockSpec((1, Np, d), lambda b, r: (b, 0, 0))

    def tile_spec(d):
        return pl.BlockSpec((1, TM, d), lambda b, r: (b, r, 0))

    flops1 = B * (4 * Np * Fp * Hp + 4 * Np * Np * Hp)
    bytes1 = 4 * (B * 2 * Np * Np + B * Np * Fp + B * Np * Hp + Fp * 2 * Hp + Hp)
    h = pl.pallas_call(
        _gcn_tiled_kernel,
        out_shape=jax.ShapeDtypeStruct((B, Np, Hp), jnp.float32),
        grid_spec=pltpu.PrefetchScalarGridSpec(
            num_scalar_prefetch=0,
            grid=(B, R),
            in_specs=[adj_spec, adj_spec, full_spec(Fp), w_spec(Fp), bias_spec],
            out_specs=tile_spec(Hp),
            scratch_shapes=[pltpu.VMEM((Np, 2 * Hp), jnp.float32)],
        ),
        compiler_params=cparams,
        cost_estimate=pl.CostEstimate(flops=flops1, transcendentals=0,
                                      bytes_accessed=bytes1),
    )(p["a0"], p["a1"], xp, p["wa"], p["ba"])

    flops2 = B * (4 * Np * Hp * Hp + 4 * Np * Np * Hp)
    bytes2 = 4 * (B * 2 * Np * Np + 2 * B * Np * Hp + B * Np * Fp + Hp * 2 * Hp + Hp)
    y = pl.pallas_call(
        _gcn_res_tiled_kernel,
        out_shape=jax.ShapeDtypeStruct((B, Np, Hp), jnp.float32),
        grid_spec=pltpu.PrefetchScalarGridSpec(
            num_scalar_prefetch=0,
            grid=(B, R),
            in_specs=[adj_spec, adj_spec, full_spec(Hp), w_spec(Hp), bias_spec,
                      tile_spec(Fp)],
            out_specs=tile_spec(Hp),
            scratch_shapes=[pltpu.VMEM((Np, 2 * Hp), jnp.float32)],
        ),
        compiler_params=cparams,
        cost_estimate=pl.CostEstimate(flops=flops2, transcendentals=0,
                                      bytes_accessed=bytes2),
    )(p["a0"], p["a1"], h, p["wb"], p["bb"], xp)
    return y


# -----------------------------------------------------------------------------
# Public API
# -----------------------------------------------------------------------------
def prepare_gresblock_params(adj0, adj1, w1a, w2a, ba, w1b, w2b, bb):
    """Pad / fuse parameters ONCE at model init (hoisted out of the hot path).

    Zero padding is exact: padded adjacency rows/cols, weight rows/cols and bias
    entries are all zero, so the valid (N, F) region of the output is unchanged.
    """
    N = int(adj0.shape[0])
    F, H = int(w1a.shape[0]), int(w1a.shape[1])
    assert F == H, "GResBlock residual requires in_dim == hidden_dim"

    Np = _round_up(N, 128)       # lane-aligned node dim (MXU-clean K for adjacency dots)
    Hp = _round_up(H, 128)       # lane-dense feature dim
    Fp = Hp

    f32 = jnp.float32
    a0 = jnp.zeros((Np, Np), f32).at[:N, :N].set(adj0.astype(f32))
    a1 = jnp.zeros((Np, Np), f32).at[:N, :N].set(adj1.astype(f32))

    def pad_w(w):
        return jnp.zeros((Fp, Hp), f32).at[:F, :H].set(w.astype(f32))

    wa = jnp.concatenate([pad_w(w1a), pad_w(w2a)], axis=1)       # (Fp, 2*Hp)
    wb = jnp.concatenate([pad_w(w1b), pad_w(w2b)], axis=1)       # (Hp, 2*Hp)
    bap = jnp.zeros((1, Hp), f32).at[:, :H].set(ba.reshape(1, -1).astype(f32))
    bbp = jnp.zeros((1, Hp), f32).at[:, :H].set(bb.reshape(1, -1).astype(f32))

    return dict(a0=a0, a1=a1, wa=wa, wb=wb, ba=bap, bb=bbp,
                N=N, F=F, Np=Np, Fp=Fp, Hp=Hp)


def gresblock(params, x, force_path=None):
    """GResBlock forward.  x: (N, F) single graph or (B, N, F) batch of graphs."""
    single = (x.ndim == 2)
    if single:
        x = x[None]
    B, N, F = x.shape
    assert N == params["N"] and F == params["F"], "shape mismatch with prepared params"
    Np, Fp, Hp = params["Np"], params["Fp"], params["Hp"]

    xp = jnp.zeros((B, Np, Fp), jnp.float32).at[:, :N, :F].set(x.astype(jnp.float32))

    if force_path is None:
        use_fused = _fused_vmem_bytes(Np, Fp, Hp) <= 0.5 * _vmem_capacity_bytes()
    else:
        use_fused = (force_path == "fused")

    out = _fused_forward(params, xp, B) if use_fused else _tiled_forward(params, xp, B)
    out = out[:, :N, :F]
    return out[0] if single else out


# -----------------------------------------------------------------------------
# Demo / correctness check
# -----------------------------------------------------------------------------
# TODO(synk): real Pixel2Mesh adjacencies (~6 nbrs/node) could use a scalar-prefetch
# neighbor-gather kernel instead of dense adjacency matmuls; dense is used here.
if __name__ == "__main__":
    key = jax.random.PRNGKey(0)

    def make_case(k, B, N, F):
        ks = jax.random.split(k, 9)
        x = jax.random.normal(ks[0], (B, N, F), dtype=jnp.float32)
        adj0 = (jax.random.uniform(ks[1], (N, N)) > 0.7).astype(jnp.float32) / N
        adj1 = (jax.random.uniform(ks[2], (N, N)) > 0.7).astype(jnp.float32) / N
        stdv = 1.0 / float(np.sqrt(F))
        u = lambda kk, shp: jax.random.uniform(kk, shp, minval=-stdv, maxval=stdv,
                                               dtype=jnp.float32)
        return (x, adj0, adj1, u(ks[3], (F, F)), u(ks[4], (F, F)), u(ks[5], (F,)),
                u(ks[6], (F, F)), u(ks[7], (F, F)), u(ks[8], (F,)))

    def reference_np(x, adj0, adj1, w1a, w2a, ba, w1b, w2b, bb):
        x, adj0, adj1, w1a, w2a, ba, w1b, w2b, bb = (
            np.asarray(a, np.float64) for a in (x, adj0, adj1, w1a, w2a, ba, w1b, w2b, bb))
        h = adj0 @ (x @ w1a) + adj1 @ (x @ w2a) + ba
        y = adj0 @ (h @ w1b) + adj1 @ (h @ w2b) + bb
        return (x + y) * 0.5

    def check(out, x, rest, tol):
        out = np.asarray(out)
        xb = np.asarray(x)
        ref = np.stack([reference_np(xb[b], *rest) for b in range(xb.shape[0])])
        err = float(np.max(np.abs(out - ref)))
        assert err < tol, f"max abs err {err}"

    # --- Case 1: small graph, batch of 2  ->  fused single-kernel path. ---
    k1, k2 = jax.random.split(key)
    B, N, F = 2, 16, 32
    case1 = make_case(k1, B, N, F)
    x1, rest1 = case1[0], case1[1:]
    params1 = prepare_gresblock_params(*rest1)

    out1 = jax.block_until_ready(gresblock(params1, x1, force_path="fused"))
    assert out1.shape == (B, N, F)
    check(out1, x1, rest1, 1e-3)

    # Single-graph call (matches the PyTorch module signature), auto path selection.
    out1s = jax.block_until_ready(gresblock(params1, x1[0]))
    assert out1s.shape == (N, F)
    check(out1s[None], x1[:1], rest1, 1e-3)

    # --- Case 2: larger graph, B=1  ->  row-tiled streaming path (two pallas_calls). ---
    B2, N2, F2 = 1, 300, 32
    case2 = make_case(k2, B2, N2, F2)
    x2, rest2 = case2[0], case2[1:]
    params2 = prepare_gresblock_params(*rest2)

    out2 = jax.block_until_ready(gresblock(params2, x2, force_path="tiled"))
    assert out2.shape == (B2, N2, F2)
    check(out2, x2, rest2, 1e-3)

    print("KERNEL_OK")
</pallas_src>

<mosaic_0001>
module attributes {stable_mosaic.version = 11 : i64} {
  func.func @_gresblock_fused_kernel(%arg0: i32, %arg1: memref<128x128xf32, #tpu.memory_space<any>>, %arg2: memref<128x128xf32, #tpu.memory_space<any>>, %arg3: memref<128x256xf32, #tpu.memory_space<vmem>>, %arg4: memref<1x128xf32, #tpu.memory_space<vmem>>, %arg5: memref<128x256xf32, #tpu.memory_space<vmem>>, %arg6: memref<1x128xf32, #tpu.memory_space<vmem>>, %arg7: memref<1x128x128xf32, #tpu.memory_space<vmem>>, %arg8: memref<1x128x128xf32, #tpu.memory_space<vmem>>, %arg9: memref<128x128xf32, #tpu.memory_space<vmem>>, %arg10: memref<128x128xf32, #tpu.memory_space<vmem>>, %arg11: memref<2x!tpu.dma_semaphore, #tpu.memory_space<semaphore_mem>>) attributes {dimension_semantics = [#tpu.dimension_semantics<arbitrary>], iteration_bounds = array<i64: 2>, scalar_prefetch = 0 : i64, scratch_operands = 3 : i64, tpu.core_type = #tpu.core_type<tc>, window_params = [{}, {}, {pipeline_mode = #tpu.pipeline_mode<synchronous>, transform_indices = @transform_2, window_bounds = array<i64: 128, 256>}, {pipeline_mode = #tpu.pipeline_mode<synchronous>, transform_indices = @transform_3, window_bounds = array<i64: 1, 128>}, {pipeline_mode = #tpu.pipeline_mode<synchronous>, transform_indices = @transform_4, window_bounds = array<i64: 128, 256>}, {pipeline_mode = #tpu.pipeline_mode<synchronous>, transform_indices = @transform_5, window_bounds = array<i64: 1, 128>}, {transform_indices = @transform_6, window_bounds = array<i64: 1, 128, 128>}, {transform_indices = @transform_7, window_bounds = array<i64: 1, 128, 128>}]} {
    %c0_i32 = arith.constant 0 : i32
    %0 = arith.cmpi eq, %arg0, %c0_i32 : i32
    %1 = arith.extui %0 : i1 to i32
    %c0_i32_0 = arith.constant 0 : i32
    %2 = arith.cmpi ne, %1, %c0_i32_0 : i32
    scf.if %2 {
      %c0_i32_24 = arith.constant 0 : i32
      %33 = tpu.memref_slice %arg11[%c0_i32_24] : memref<2x!tpu.dma_semaphore, #tpu.memory_space<semaphore_mem>> -> memref<1x!tpu.dma_semaphore, #tpu.memory_space<semaphore_mem>>
      %34 = tpu.memref_squeeze %33 : memref<1x!tpu.dma_semaphore, #tpu.memory_space<semaphore_mem>> -> memref<!tpu.dma_semaphore, #tpu.memory_space<semaphore_mem>>
      tpu.enqueue_dma source(%arg1 : memref<128x128xf32, #tpu.memory_space<any>>) target(%arg9 : memref<128x128xf32, #tpu.memory_space<vmem>>) target_semaphore(%34 : memref<!tpu.dma_semaphore, #tpu.memory_space<semaphore_mem>>)
      %c1_i32 = arith.constant 1 : i32
      %35 = tpu.memref_slice %arg11[%c1_i32] : memref<2x!tpu.dma_semaphore, #tpu.memory_space<semaphore_mem>> -> memref<1x!tpu.dma_semaphore, #tpu.memory_space<semaphore_mem>>
      %36 = tpu.memref_squeeze %35 : memref<1x!tpu.dma_semaphore, #tpu.memory_space<semaphore_mem>> -> memref<!tpu.dma_semaphore, #tpu.memory_space<semaphore_mem>>
      tpu.enqueue_dma source(%arg2 : memref<128x128xf32, #tpu.memory_space<any>>) target(%arg10 : memref<128x128xf32, #tpu.memory_space<vmem>>) target_semaphore(%36 : memref<!tpu.dma_semaphore, #tpu.memory_space<semaphore_mem>>)
      %c0_i32_25 = arith.constant 0 : i32
      %37 = tpu.memref_slice %arg11[%c0_i32_25] : memref<2x!tpu.dma_semaphore, #tpu.memory_space<semaphore_mem>> -> memref<1x!tpu.dma_semaphore, #tpu.memory_space<semaphore_mem>>
      %38 = tpu.memref_squeeze %37 : memref<1x!tpu.dma_semaphore, #tpu.memory_space<semaphore_mem>> -> memref<!tpu.dma_semaphore, #tpu.memory_space<semaphore_mem>>
      tpu.wait_dma2 semaphore(%38 : memref<!tpu.dma_semaphore, #tpu.memory_space<semaphore_mem>>) src(%arg1 : memref<128x128xf32, #tpu.memory_space<any>>) dst(%arg9 : memref<128x128xf32, #tpu.memory_space<vmem>>)
      %c1_i32_26 = arith.constant 1 : i32
      %39 = tpu.memref_slice %arg11[%c1_i32_26] : memref<2x!tpu.dma_semaphore, #tpu.memory_space<semaphore_mem>> -> memref<1x!tpu.dma_semaphore, #tpu.memory_space<semaphore_mem>>
      %40 = tpu.memref_squeeze %39 : memref<1x!tpu.dma_semaphore, #tpu.memory_space<semaphore_mem>> -> memref<!tpu.dma_semaphore, #tpu.memory_space<semaphore_mem>>
      tpu.wait_dma2 semaphore(%40 : memref<!tpu.dma_semaphore, #tpu.memory_space<semaphore_mem>>) src(%arg2 : memref<128x128xf32, #tpu.memory_space<any>>) dst(%arg10 : memref<128x128xf32, #tpu.memory_space<vmem>>)
    } else {
    }
    %c0 = arith.constant 0 : index
    %c0_1 = arith.constant 0 : index
    %c0_2 = arith.constant 0 : index
    %3 = vector.load %arg7[%c0, %c0_1, %c0_2] : memref<1x128x128xf32, #tpu.memory_space<vmem>>, vector<1x128x128xf32>
    %4 = vector.shape_cast %3 : vector<1x128x128xf32> to vector<128x128xf32>
    %c0_3 = arith.constant 0 : index
    %c0_4 = arith.constant 0 : index
    %5 = vector.load %arg9[%c0_3, %c0_4] : memref<128x128xf32, #tpu.memory_space<vmem>>, vector<128x128xf32>
    %c0_5 = arith.constant 0 : index
    %c0_6 = arith.constant 0 : index
    %6 = vector.load %arg10[%c0_5, %c0_6] : memref<128x128xf32, #tpu.memory_space<vmem>>, vector<128x128xf32>
    %c0_7 = arith.constant 0 : index
    %c0_8 = arith.constant 0 : index
    %7 = vector.load %arg3[%c0_7, %c0_8] : memref<128x256xf32, #tpu.memory_space<vmem>>, vector<128x256xf32>
    %cst = arith.constant dense<0.000000e+00> : vector<128x256xf32>
    %8 = tpu.matmul %4, %7, %cst {dimension_numbers = #tpu.dot_dimension_numbers<[1], [0], [0], [1], [0, 0, 1, 1], [], []>} : vector<128x128xf32>, vector<128x256xf32>, vector<128x256xf32> -> vector<128x256xf32>
    %9 = vector.extract_strided_slice %8 {offsets = [0, 0], sizes = [128, 128], strides = [1, 1]} : vector<128x256xf32> to vector<128x128xf32>
    %cst_9 = arith.constant dense<0.000000e+00> : vector<128x128xf32>
    %10 = tpu.matmul %5, %9, %cst_9 {dimension_numbers = #tpu.dot_dimension_numbers<[1], [0], [0], [1], [0, 0, 1, 1], [], []>} : vector<128x128xf32>, vector<128x128xf32>, vector<128x128xf32> -> vector<128x128xf32>
    %11 = vector.extract_strided_slice %8 {offsets = [0, 128], sizes = [128, 128], strides = [1, 1]} : vector<128x256xf32> to vector<128x128xf32>
    %cst_10 = arith.constant dense<0.000000e+00> : vector<128x128xf32>
    %12 = tpu.matmul %6, %11, %cst_10 {dimension_numbers = #tpu.dot_dimension_numbers<[1], [0], [0], [1], [0, 0, 1, 1], [], []>} : vector<128x128xf32>, vector<128x128xf32>, vector<128x128xf32> -> vector<128x128xf32>
    %13 = arith.addf %10, %12 : vector<128x128xf32>
    %c0_11 = arith.constant 0 : index
    %c0_12 = arith.constant 0 : index
    %14 = vector.load %arg4[%c0_11, %c0_12] : memref<1x128xf32, #tpu.memory_space<vmem>>, vector<1x128xf32>
    %15 = vector.broadcast %14 : vector<1x128xf32> to vector<128x128xf32>
    %16 = arith.addf %13, %15 : vector<128x128xf32>
    %c0_13 = arith.constant 0 : index
    %c0_14 = arith.constant 0 : index
    %17 = vector.load %arg5[%c0_13, %c0_14] : memref<128x256xf32, #tpu.memory_space<vmem>>, vector<128x256xf32>
    %cst_15 = arith.constant dense<0.000000e+00> : vector<128x256xf32>
    %18 = tpu.matmul %16, %17, %cst_15 {dimension_numbers = #tpu.dot_dimension_numbers<[1], [0], [0], [1], [0, 0, 1, 1], [], []>} : vector<128x128xf32>, vector<128x256xf32>, vector<128x256xf32> -> vector<128x256xf32>
    %19 = vector.extract_strided_slice %18 {offsets = [0, 0], sizes = [128, 128], strides = [1, 1]} : vector<128x256xf32> to vector<128x128xf32>
    %cst_16 = arith.constant dense<0.000000e+00> : vector<128x128xf32>
    %20 = tpu.matmul %5, %19, %cst_16 {dimension_numbers = #tpu.dot_dimension_numbers<[1], [0], [0], [1], [0, 0, 1, 1], [], []>} : vector<128x128xf32>, vector<128x128xf32>, vector<128x128xf32> -> vector<128x128xf32>
    %21 = vector.extract_strided_slice %18 {offsets = [0, 128], sizes = [128, 128], strides = [1, 1]} : vector<128x256xf32> to vector<128x128xf32>
    %cst_17 = arith.constant dense<0.000000e+00> : vector<128x128xf32>
    %22 = tpu.matmul %6, %21, %cst_17 {dimension_numbers = #tpu.dot_dimension_numbers<[1], [0], [0], [1], [0, 0, 1, 1], [], []>} : vector<128x128xf32>, vector<128x128xf32>, vector<128x128xf32> -> vector<128x128xf32>
    %23 = arith.addf %20, %22 : vector<128x128xf32>
    %c0_18 = arith.constant 0 : index
    %c0_19 = arith.constant 0 : index
    %24 = vector.load %arg6[%c0_18, %c0_19] : memref<1x128xf32, #tpu.memory_space<vmem>>, vector<1x128xf32>
    %25 = vector.broadcast %24 : vector<1x128xf32> to vector<128x128xf32>
    %26 = arith.addf %23, %25 : vector<128x128xf32>
    %27 = arith.addf %4, %26 : vector<128x128xf32>
    %cst_20 = arith.constant 5.000000e-01 : f32
    %28 = vector.broadcast %cst_20 : f32 to vector<128x128xf32>
    %29 = arith.mulf %27, %28 : vector<128x128xf32>
    %c0_21 = arith.constant 0 : index
    %c0_22 = arith.constant 0 : index
    %c0_23 = arith.constant 0 : index
    %30 = vector.load %arg8[%c0_21, %c0_22, %c0_23] : memref<1x128x128xf32, #tpu.memory_space<vmem>>, vector<1x128x128xf32>
    %31 = vector.shape_cast %30 : vector<1x128x128xf32> to vector<128x128xf32>
    %32 = vector.shape_cast %29 : vector<128x128xf32> to vector<1x128x128xf32>
    tpu.vector_store %arg8[%c0_21, %c0_22, %c0_23], %32 {strides = array<i32>} : memref<1x128x128xf32, #tpu.memory_space<vmem>>, vector<1x128x128xf32>,
    return
  }
  func.func @transform_2(%arg0: i32) -> (i32, i32) {
    %c0_i32 = arith.constant 0 : i32
    %c0_i32_0 = arith.constant 0 : i32
    %c0_i32_1 = arith.constant 0 : i32
    return %c0_i32, %c0_i32_0 : i32, i32
  }
  func.func @transform_3(%arg0: i32) -> (i32, i32) {
    %c0_i32 = arith.constant 0 : i32
    %c0_i32_0 = arith.constant 0 : i32
    %c0_i32_1 = arith.constant 0 : i32
    return %c0_i32, %c0_i32_0 : i32, i32
  }
  func.func @transform_4(%arg0: i32) -> (i32, i32) {
    %c0_i32 = arith.constant 0 : i32
    %c0_i32_0 = arith.constant 0 : i32
    %c0_i32_1 = arith.constant 0 : i32
    return %c0_i32, %c0_i32_0 : i32, i32
  }
  func.func @transform_5(%arg0: i32) -> (i32, i32) {
    %c0_i32 = arith.constant 0 : i32
    %c0_i32_0 = arith.constant 0 : i32
    %c0_i32_1 = arith.constant 0 : i32
    return %c0_i32, %c0_i32_0 : i32, i32
  }
  func.func @transform_6(%arg0: i32) -> (i32, i32, i32) {
    %c0_i32 = arith.constant 0 : i32
    %c0_i32_0 = arith.constant 0 : i32
    %c0_i32_1 = arith.constant 0 : i32
    return %arg0, %c0_i32, %c0_i32_0 : i32, i32, i32
  }
  func.func @transform_7(%arg0: i32) -> (i32, i32, i32) {
    %c0_i32 = arith.constant 0 : i32
    %c0_i32_0 = arith.constant 0 : i32
    %c0_i32_1 = arith.constant 0 : i32
    return %arg0, %c0_i32, %c0_i32_0 : i32, i32, i32
  }
}

</mosaic_0001>

<bundles_post_ra>
// kernel: tpu_custom_call.1
= control target key start
LH: loop header
LB: loop body
LE: loop exit
PB: predicated region body
PF: predicated region fallthrough
CT: control target
= control target key end

     0   :  { %12 = vsyncpa [#allocation6], 0  ;;  %s3066_s0 = inlined_call_operand.hbm [shape: f32[128,128], index: 0, kind: input, shape index: {}]   ;;  %s3067_s1 = inlined_call_operand.hbm [shape: f32[128,128], index: 1, kind: input, shape index: {}]   ;;  %s3068_s2 = inlined_call_operand.hbm [shape: f32[128,256], index: 2, kind: input, shape index: {}]   ;;  %s3069_s3 = inlined_call_operand.vmem [shape: f32[1,128], index: 3, kind: input, shape index: {}]   ;;  %s3070_s4 = inlined_call_operand.hbm [shape: f32[128,256], index: 4, kind: input, shape index: {}]   ;;  %s3071_s5 = inlined_call_operand.vmem [shape: f32[1,128], index: 5, kind: input, shape index: {}]   ;;  %s3072_s6 = inlined_call_operand.hbm [shape: f32[2,128,128], index: 6, kind: input, shape index: {}]   ;;  %s3073_s7 = inlined_call_operand.hbm [shape: f32[2,128,128], index: 7, kind: output, shape index: {}]  }
   0x1   :  { %13 = vsyncpa [#allocation9], 0 }
   0x2   :  { %14 = vsyncpa [#allocation7], 0 }
   0x3   :  { %16 = vsyncpa [#allocation7 + $0x1], 0  ;;  %s2489_s24 = smov 0   ;;  %s2491_s25 = smov 0  }
   0x4   :  { %s2493_s26 = smov 0   ;;  %s2495_s27 = smov 0  }
   0x5 LB: > { %s2510_s28 = sadd.s32 4294967295, %s2434_s27   ;;  %s1531_s29 = sadd.s32 4294967294, %s2434_s27   ;;  %s2434_s27 = sphi %s2495_s27, %s3129_s27   ;;  %s2430_s26 = sphi %s2493_s26, %s3133_s26   ;;  %s2426_s25 = sphi %s2491_s25, %s3132_s25   ;;  %s2422_s24 = sphi %s2489_s24, %s3131_s24  }
   0x6   : > { %s2514_s30 = sadd.s32 1, %s2434_s27   ;;  %s113_s8 = sadd.s32 1, %s2430_s26 }
   0x7   : > { %3087 = sst [smem:[#allocation24_spill]] %s2514_s30  ;;  %s110_s9 = ssub.s32 %s2434_s27, %s2514_s30 }
   0x8   : > { %p120_p0 = scmp.ne.s32.totalorder %s2430_s26, %s2426_s25  ;;  %p111_p1 = scmp.eq.s32.totalorder %s110_s9, 0 }
   0x9   : > { %p121_p2 = scmp.eq.s32.totalorder %s2434_s27, 0  ;;  %p126_p3 = scmp.ne.s32.totalorder %s2426_s25, %s2422_s24 }
   0xa   : > { %p3074_p4 = scmp.eq.s32.totalorder %s2510_s28, 0  ;;  %p150_p7 = scmp.eq.s32.totalorder %s2510_s28, 1 }
   0xb   : > { %s2526_s10 = scalar_select %p111_p1, %s2430_s26, %s113_s8  }
   0xc   : > { %p2528_p5 = por %p121_p2, %p120_p0  ;;  %p2534_p6 = por %p3074_p4, %p126_p3 }
   0xd   : > { %3088 = sst [smem:[#allocation25_spill]] %s2526_s10  ;;  %p156_p8 = scmp.eq.s32.totalorder %s1531_s29, 1 }
   0xe   : > { %s3089_s11 = scalar_select %p2528_p5, 1, 0 }
   0xf   : > { %s3090_s12 = scalar_select %p2534_p6, 1, 0 }
  0x10   : > { %p1532_p9 = scmp.ge.s32.totalorder %s2434_s27, 1  ;;  %p163_p10 = scmp.lt.s32.totalorder %s2434_s27, 3 }
  0x11   : > { %p2541_p11 = por %p150_p7, %p120_p0  ;;  %p2545_p12 = por %p156_p8, %p126_p3 }
  0x12   : > { %p2549_p13 = pnand %p1532_p9, %p163_p10  ;;  %s2436_s16 = smov [#allocation5]  }
  0x13   : > { %s3091_s13 = scalar_select %p2541_p11, 1, 0 }
  0x14   : > { %s3092_s14 = scalar_select %p2545_p12, 1, 0 }
  0x15   : > { %s3093_s15 = scalar_select %p2549_p13, 1, 0 }
  0x16   : > { %p2149_p1 = pneg %p2549_p13  ;;  %s175_s17 = sshll.u32 %s2436_s16, 4  ;;  %s176_s17 = int_to_ptr.vmem [resolvable:$true] %s175_s17 }
  0x17   : > { %s2437_s19 = smov [#allocation8]   ;;  %s2214_s23 = scalar_lea.hbm %s3068_s2, 4096 }
  0x18   : > { %p2557_p2 = pnand %p2149_p1, %p3074_p4  ;;  %s191_s20 = sshll.u32 %s2437_s19, 4  ;;  %s192_s20 = int_to_ptr.vmem [resolvable:$true] %s191_s20 }
  0x19   : > { %p2215_p7 = scmp.ne.s32.totalorder %s3068_s2, %s2214_s23  ;;  %p2221_p1 = scmp.lt.u32.totalorder %s2214_s23, %s3068_s2 }
  0x1a   : > { %p2216_p8 = pneg %p2557_p2 }
  0x1c   : > { %p2217_p9 = pnand %p2216_p8, %p2215_p7 }
  0x1e   : > { %p2218_p10 = pneg %p2217_p9 }
  0x20   : > { %p2223_p0 = pnand %p2221_p1, %p2218_p10 }
  0x22   : > { %2226 = shalt.err (!%p2223_p0)
}
  0x23   : > { %s2227_s19 = scalar_lea.vmem %s176_s17, 4096  ;;  %p2235_p11 = scmp.lt.s32.totalorder %s176_s17, %s176_s17 }
  0x24   : > { %p2228_p4 = scmp.ne.s32.totalorder %s176_s17, %s2227_s19  ;;  %p2236_p6 = scmp.lt.s32.totalorder %s2227_s19, %s2227_s19 }
  0x26   : > { %p2230_p3 = pnand %p2228_p4, %p2216_p8  ;;  %p2237_p13 = por %p2236_p6, %p2235_p11 }
  0x28   : > { %p2231_p12 = pneg %p2230_p3 }
  0x2a   : > { %p2238_p5 = pnand %p2237_p13, %p2231_p12 }
  0x2c   : > { %2241 = shalt.err (!%p2238_p5)
}
  0x2d   : > { %s2438_s21 = smov 256   ;;  %s2439_s22 = smov 16  }
  0x2e   : > { %2152 = dma.hbm_to_vmem [thread:$0]  (!%p2557_p2), %s3068_s2, 4096, %s176_s17, [#allocation6], %s2438_s21, %s2438_s21, %s2439_s22  }
  0x2f   : > { %p3095_p0 = scmp.ne.s32.totalorder %s3089_s11, 0  ;;  %p3096_p7 = scmp.lt.s32.totalorder %s2434_s27, 2 }
  0x30   : > { %s2242_s19 = scalar_lea.hbm %s3070_s4, 4096 }
  0x31   : > { %p2589_p4 = pnand %p3096_p7, %p3095_p0  ;;  %p2243_p5 = scmp.ne.s32.totalorder %s3070_s4, %s2242_s19 }
  0x32   : > { %p2249_p12 = scmp.lt.u32.totalorder %s2242_s19, %s3070_s4 }
  0x33   : > { %s3097_s8 = scalar_select %p2589_p4, 1, 0 }
  0x34   : > { %p2245_p6 = pnand %p2243_p5, %p2216_p8 }
  0x36   : > { %p2246_p11 = pneg %p2245_p6 }
  0x38   : > { %p2251_p13 = pnand %p2249_p12, %p2246_p11 }
  0x3a   : > { %2254 = shalt.err (!%p2251_p13)
}
  0x3b   : > { %s2255_s23 = scalar_lea.vmem %s192_s20, 4096  ;;  %p2263_p1 = scmp.lt.s32.totalorder %s192_s20, %s192_s20 }
  0x3c   : > { %p2256_p3 = scmp.ne.s32.totalorder %s192_s20, %s2255_s23  ;;  %p2264_p0 = scmp.lt.s32.totalorder %s2255_s23, %s2255_s23 }
  0x3e   : > { %p2258_p9 = pnand %p2256_p3, %p2216_p8  ;;  %p2265_p7 = por %p2264_p0, %p2263_p1 }
  0x40   : > { %p2259_p10 = pneg %p2258_p9 }
  0x42   : > { %p2266_p4 = pnand %p2265_p7, %p2259_p10 }
  0x44   : > { %2269 = shalt.err (!%p2266_p4)
}
  0x45   : > { %2155 = dma.hbm_to_vmem [thread:$0]  (!%p2557_p2), %s3070_s4, 4096, %s192_s20, [#allocation9], %s2438_s21, %s2438_s21, %s2439_s22  }
  0x46   : > { %s208_s29 = sand.u32 1, %s2434_s27   ;;  %s210_s9 = sand.u32 1, %s2430_s26  }
  0x47   : > { %s1536_s16 = sshll.u32 %s210_s9, 7  ;;  %s1554_s19 = sshll.u32 %s2434_s27, 11 }
  0x48   : > { %s2619_s23 = scalar_lea.hbm %s3072_s6, %s1554_s19  ;;  %s212_s18 = scalar_lea.vmem [#allocation10], %s1536_s16 }
  0x49   : > { %s219_s30 = sshll.u32 %s212_s18, 4  ;;  %s2623_s10 = scalar_lea.sflag [#allocation6], %s208_s29  ;;  %s2621_s30 = int_to_ptr.vmem [resolvable:$true] %s219_s30 }
  0x4a   : > { %s2270_s20 = scalar_lea.hbm %s2619_s23, 2048  ;;  %p3098_p8 = scmp.ne.s32.totalorder %s3097_s8, 0 }
  0x4b   : > { %p2271_p2 = scmp.ne.s32.totalorder %s2619_s23, %s2270_s20  ;;  %s2275_s9 = scalar_lea.hbm %s3072_s6, 4096 }
  0x4c   : > { %p2272_p4 = pneg %p3098_p8  ;;  %p2276_p11 = scmp.lt.u32.totalorder %s2619_s23, %s3072_s6 }
  0x4d   : > { %p2277_p12 = scmp.lt.u32.totalorder %s2275_s9, %s2270_s20  ;;  %p2279_p3 = scmp.lt.u32.totalorder %s2270_s20, %s2619_s23 }
  0x4e   : > { %p2273_p5 = pnand %p2272_p4, %p2271_p2 }
  0x4f   : > { %p2278_p13 = por %p2277_p12, %p2276_p11 }
  0x50   : > { %p2274_p6 = pneg %p2273_p5 }
  0x51   : > { %p2280_p9 = por %p2279_p3, %p2278_p13 }
  0x53   : > { %p2281_p10 = pnand %p2280_p9, %p2274_p6 }
  0x55   : > { %2284 = shalt.err (!%p2281_p10)
}
  0x56   : > { %s2285_s29 = scalar_lea.vmem %s2621_s30, 2048  ;;  %s2440_s16 = smov [#allocation10]  }
  0x57   : > { %p2286_p1 = scmp.ne.s32.totalorder %s2621_s30, %s2285_s29  ;;  %s2290_s11 = sshll.u32 %s2440_s16, 4  ;;  %s2291_s11 = int_to_ptr.vmem [resolvable:$false] %s2290_s11 }
  0x58   : > { %s2292_s18 = scalar_lea.vmem %s2291_s11, 4096  ;;  %p2293_p2 = scmp.lt.s32.totalorder %s2621_s30, %s2291_s11 }
  0x59   : > { %p2288_p0 = pnand %p2286_p1, %p2272_p4  ;;  %p2294_p5 = scmp.lt.s32.totalorder %s2292_s18, %s2285_s29 }
  0x5b   : > { %p2289_p7 = pneg %p2288_p0  ;;  %p2295_p11 = por %p2294_p5, %p2293_p2 }
  0x5d   : > { %p2296_p12 = pnand %p2295_p11, %p2289_p7 }
  0x5f   : > { %2299 = shalt.err (!%p2296_p12)
}
  0x60   : > { %s2441_s20 = smov 128   ;;  %s2442_s21 = smov 8  }
  0x61   : > { %2159 = dma.hbm_to_vmem [thread:$0]  (!%p3098_p8), %s2619_s23, 2048, %s2621_s30, %s2623_s10, %s2441_s20, %s2441_s20, %s2442_s21  }
  0x62   : > { %p3099_p4 = scmp.ne.s32.totalorder %s3093_s15, 0 }
  0x64   : > { %231 = sbr.rel (%p3099_p4) target bundleno = 1303 (0x517), region = 40 }
  0x6b   : > { %p3100_p6 = scmp.eq.s32.totalorder %s2510_s28, 0 }
  0x6d   : > { %2397 = dma.done.wait (%p3100_p6), [#allocation6], 4096   ;;  %p3101_p13 = pmov %p3100_p6 }
  0x6e   : > { %p3102_p3 = pmov %p3100_p6 }
  0x6f   : > { %2399 = vsyncadd (%p3101_p13), [#allocation6], 4294963200 }
  0x70   : > { %2401 = dma.done.wait (%p3102_p3), [#allocation9], 4096   ;;  %p3103_p9 = pmov %p3102_p3 }
  0x71   : > { %s241_s8 = sand.u32 1, %s2510_s28   ;;  %s243_s23 = sand.u32 1, %s2426_s25  }
  0x72   : > { %2403 = vsyncadd (%p3103_p9), [#allocation9], 4294963200  ;;  %s2665_s15 = sshll.u32 %s243_s23, 7  ;;  %s242_s30 = scalar_lea.sflag [#allocation6], %s241_s8 }
  0x73   : > { %s2668_s10 = scalar_lea.vmem [#allocation10], %s2665_s15  ;;  %p3104_p8 = scmp.ne.s32.totalorder %s3090_s12, 0 }
  0x75   : > { %2405 = dma.done.wait (%p3104_p8), %s242_s30, 2048  }
  0x76   : > { %2407 = vsyncadd (%p3104_p8), %s242_s30, 4294965248  ;;  %s2443_s22 = smov [#allocation2]   ;;  %s2444_s19 = smov [#allocation3]  }
  0x77   : > { %s283_s9 = sshll.u32 %s2443_s22, 4  ;;  %s295_s17 = sshll.u32 %s2444_s19, 4  ;;  %s284_s9 = int_to_ptr.vmem [resolvable:$true] %s283_s9  ;;  %s296_s17 = int_to_ptr.vmem [resolvable:$true] %s295_s17 }
  0x78   : > { %s2300_s11 = scalar_lea.hbm %s3066_s0, 2048  ;;  %p3105_p1 = pmov %p3102_p3 }
  0x79   : > { %p2301_p10 = scmp.ne.s32.totalorder %s3066_s0, %s2300_s11  ;;  %p2306_p2 = scmp.lt.u32.totalorder %s2300_s11, %s3066_s0 }
  0x7b   : > { %p2302_p0 = pnand %p2301_p10, %p3105_p1 }
  0x7d   : > { %p2303_p7 = pneg %p2302_p0 }
  0x7f   : > { %p2308_p5 = pnand %p2306_p2, %p2303_p7 }
  0x81   : > { %2311 = shalt.err (!%p2308_p5)  }
  0x82   : > { %s2312_s8 = scalar_lea.vmem %s284_s9, 2048  ;;  %p3106_p12 = pmov %p3105_p1 }
  0x83   : > { %p2313_p11 = scmp.ne.s32.totalorder %s284_s9, %s2312_s8  ;;  %p2319_p13 = scmp.lt.s32.totalorder %s284_s9, %s284_s9 }
  0x84   : > { %p2320_p3 = scmp.lt.s32.totalorder %s2312_s8, %s2312_s8 }
  0x85   : > { %p2314_p4 = pnand %p2313_p11, %p3106_p12 }
  0x86   : > { %p2321_p9 = por %p2320_p3, %p2319_p13 }
  0x87   : > { %p2315_p6 = pneg %p2314_p4 }
  0x89   : > { %p2322_p8 = pnand %p2321_p9, %p2315_p6 }
  0x8b   : > { %2325 = shalt.err (!%p2322_p8)  }
  0x8c   : > { %p3107_p10 = pmov %p3105_p1  ;;  %s2326_s16 = scalar_lea.hbm %s3067_s1, 2048 }
  0x8d   : > { %p2327_p1 = scmp.ne.s32.totalorder %s3067_s1, %s2326_s16  ;;  %p2332_p5 = scmp.lt.u32.totalorder %s2326_s16, %s3067_s1 }
  0x8e   : > { %2143 = dma.hbm_to_vmem [thread:$0]  (%p3107_p10), %s3066_s0, 2048, %s284_s9, [#allocation4] }
  0x8f   : > { %p3108_p0 = pmov %p3107_p10 }
  0x91   : > { %p2328_p7 = pnand %p2327_p1, %p3108_p0 }
  0x93   : > { %p2329_p2 = pneg %p2328_p7 }
  0x95   : > { %p2334_p11 = pnand %p2332_p5, %p2329_p2 }
  0x97   : > { %2337 = shalt.err (!%p2334_p11)  }
  0x98   : > { %s2338_s12 = scalar_lea.vmem %s296_s17, 2048  ;;  %p3109_p4 = pmov %p3108_p0 }
  0x99   : > { %p2339_p12 = scmp.ne.s32.totalorder %s296_s17, %s2338_s12  ;;  %p2345_p3 = scmp.lt.s32.totalorder %s296_s17, %s296_s17 }
  0x9a   : > { %p2346_p9 = scmp.lt.s32.totalorder %s2338_s12, %s2338_s12 }
  0x9b   : > { %p2340_p6 = pnand %p2339_p12, %p3109_p4 }
  0x9c   : > { %p2347_p8 = por %p2346_p9, %p2345_p3 }
  0x9d   : > { %p2341_p13 = pneg %p2340_p6 }
  0x9f   : > { %p2348_p10 = pnand %p2347_p8, %p2341_p13 }
  0xa1   : > { %2351 = shalt.err (!%p2348_p10)  }
  0xa2   : > { %p3110_p1 = pmov %p3108_p0  ;;  %s2711_s30 = scalar_lea.vmem [#allocation11], %s2665_s15 }
  0xa4   : > { %2144 = dma.hbm_to_vmem [thread:$0]  (%p3110_p1), %s3067_s1, 2048, %s296_s17, [#allocation4 + $0x1] }
  0xa5   : > { %2409 = dma.done.wait (%p3108_p0), [#allocation4], 2048  ;;  %p3111_p7 = pmov %p3108_p0 }
  0xa6   : > { %p3112_p2 = pmov %p3108_p0 }
  0xa7   : > { %2411 = vsyncadd (%p3111_p7), [#allocation4], 4294965248 }
  0xa8   : > { %2413 = dma.done.wait (%p3112_p2), [#allocation4 + $0x1], 2048  ;;  %p3113_p5 = pmov %p3108_p0 }
  0xa9   : > { %v2445_v0 = vmov 0.0   ;;  %v353_v1 = vld [vmem:[#allocation5 + $0x8] sm:$0xff]  ;;  %v355_v2 = vld [vmem:[#allocation5 + $0x18] sm:$0xff]  ;;  %v352_v3 = vld [vmem:[#allocation5] sm:$0xff]  ;;  %s1555_s19 = sshll.u32 %s2510_s28, 11  ;;  %s1426_s29 = sshll.u32 %s2711_s30, 4  ;;  %s3018_s29 = int_to_ptr.vmem [resolvable:$true] %s1426_s29 }
  0xaa   : > { %2415 = vsyncadd (%p3113_p5), [#allocation4 + $0x1], 4294965248  ;;  %448 = vmatprep.mubr.f32.mxu0 %v2445_v0  ;;  %v1908_v4 = vpack.c.bf16 %v355_v2, %v353_v1  ;;  %v354_v5 = vld [vmem:[#allocation5 + $0x10] sm:$0xff]  ;;  %v357_v6 = vld [vmem:[#allocation5 + $0x28] sm:$0xff]  ;;  %s3016_s18 = scalar_lea.hbm %s3073_s7, %s1555_s19  ;;  %s3024_s28 = scalar_lea.sflag [#allocation7], %s243_s23 }
  0xab   : > { %v359_v7 = vld [vmem:[#allocation5 + $0x38] sm:$0xff]  ;;  %v1910_v8 = vpack.c.bf16 %v354_v5, %v352_v3  ;;  %v356_v10 = vld [vmem:[#allocation5 + $0x20] sm:$0xff]  ;;  %v358_v11 = vld [vmem:[#allocation5 + $0x30] sm:$0xff]  ;;  %s2352_s20 = scalar_lea.vmem %s3018_s29, 2048  ;;  %p3126_p12 = scmp.ne.s32.totalorder %s3091_s13, 0 }
  0xac   : > { %v1912_v9 = vpack.c.bf16 %v359_v7, %v357_v6  ;;  %v361_v12 = vld [vmem:[#allocation5 + $0x48] sm:$0xff]  ;;  %1909 = vmatprep.subr.bf16.mxu0 %v1908_v4  ;;  %v363_v13 = vld [vmem:[#allocation5 + $0x58] sm:$0xff]  ;;  %v1914_v14 = vpack.c.bf16 %v358_v11, %v356_v10  ;;  %v360_v16 = vld [vmem:[#allocation5 + $0x40] sm:$0xff]  ;;  %p2353_p11 = scmp.ne.s32.totalorder %s3018_s29, %s2352_s20  ;;  %s2446_s21 = smov [#allocation11]  }
  0xad   : > { %1911 = vmatpush1.bf16.msra.mxu0 %v1910_v8  ;;  %v1916_v15 = vpack.c.bf16 %v363_v13, %v361_v12  ;;  %v362_v17 = vld [vmem:[#allocation5 + $0x50] sm:$0xff]  ;;  %v365_v18 = vld [vmem:[#allocation5 + $0x68] sm:$0xff]  ;;  %v367_v19 = vld [vmem:[#allocation5 + $0x78] sm:$0xff]  ;;  %s2356_s12 = sshll.u32 %s2446_s21, 4  ;;  %s2357_s12 = int_to_ptr.vmem [resolvable:$false] %s2356_s12 }
  0xae   : > { %1913 = vmatprep.subr.bf16.mxu0 %v1912_v9  ;;  %v1918_v20 = vpack.c.bf16 %v362_v17, %v360_v16  ;;  %v1920_v21 = vpack.c.bf16 %v367_v19, %v365_v18  ;;  %v364_v22 = vld [vmem:[#allocation5 + $0x60] sm:$0xff]  ;;  %v366_v23 = vld [vmem:[#allocation5 + $0x70] sm:$0xff]  ;;  %v369_v24 = vld [vmem:[#allocation5 + $0x88] sm:$0xff]  ;;  %p2354_p4 = pnand %p2353_p11, %p3126_p12  ;;  %s2358_s9 = scalar_lea.vmem %s2357_s12, 4096 }
  0xaf   : > { %v371_v25 = vld [vmem:[#allocation5 + $0x98] sm:$0xff]  ;;  %v1922_v26 = vpack.c.bf16 %v366_v23, %v364_v22  ;;  %v368_v28 = vld [vmem:[#allocation5 + $0x80] sm:$0xff]  ;;  %v370_v29 = vld [vmem:[#allocation5 + $0x90] sm:$0xff]  ;;  %p2359_p13 = scmp.lt.s32.totalorder %s3018_s29, %s2357_s12  ;;  %p2360_p3 = scmp.lt.s32.totalorder %s2358_s9, %s2352_s20 }
  0xb0   : > { %v1924_v27 = vpack.c.bf16 %v371_v25, %v369_v24  ;;  %v373_v30 = vld [vmem:[#allocation5 + $0xa8] sm:$0xff]  ;;  %v375_v31 = vld [vmem:[#allocation5 + $0xb8] sm:$0xff]  ;;  %v1926_v32 = vpack.c.bf16 %v370_v29, %v368_v28  ;;  %v372_v34 = vld [vmem:[#allocation5 + $0xa0] sm:$0xff]  ;;  %p2355_p6 = pneg %p2354_p4 }
  0xb1   : > { %1915 = vmatpush1.bf16.msra.mxu0 %v1914_v14  ;;  %v1928_v33 = vpack.c.bf16 %v375_v31, %v373_v30  ;;  %v374_v35 = vld [vmem:[#allocation5 + $0xb0] sm:$0xff]  ;;  %v377_v36 = vld [vmem:[#allocation5 + $0xc8] sm:$0xff]  ;;  %v379_v37 = vld [vmem:[#allocation5 + $0xd8] sm:$0xff]  ;;  %p2361_p9 = por %p2360_p3, %p2359_p13 }
  0xb2   : > { %1917 = vmatprep.subr.bf16.mxu0 %v1916_v15  ;;  %v1930_v38 = vpack.c.bf16 %v374_v35, %v372_v34  ;;  %v1932_v39 = vpack.c.bf16 %v379_v37, %v377_v36  ;;  %v376_v40 = vld [vmem:[#allocation5 + $0xc0] sm:$0xff]  ;;  %v378_v41 = vld [vmem:[#allocation5 + $0xd0] sm:$0xff]  ;;  %v381_v42 = vld [vmem:[#allocation5 + $0xe8] sm:$0xff] }
  0xb3   : > { %v383_v43 = vld [vmem:[#allocation5 + $0xf8] sm:$0xff]  ;;  %v1934_v44 = vpack.c.bf16 %v378_v41, %v376_v40  ;;  %v380_v46 = vld [vmem:[#allocation5 + $0xe0] sm:$0xff]  ;;  %v382_v47 = vld [vmem:[#allocation5 + $0xf0] sm:$0xff]  ;;  %p2362_p8 = pnand %p2361_p9, %p2355_p6 }
  0xb4   : > { %v1936_v45 = vpack.c.bf16 %v383_v43, %v381_v42  ;;  %v1938_v48 = vpack.c.bf16 %v382_v47, %v380_v46  ;;  %v2723_v49 = vld [vmem:[%s2668_s10] sm:$0xff]  ;;  %v2728_v50 = vld [vmem:[%s2668_s10 + $0x8] sm:$0xff]  ;;  %v2733_v51 = vld [vmem:[%s2668_s10 + $0x10] sm:$0xff] }
  0xb5   : > { %1919 = vmatpush1.bf16.msra.mxu0 %v1918_v20  ;;  %v2738_v52 = vld [vmem:[%s2668_s10 + $0x18] sm:$0xff]  ;;  %v2743_v53 = vld [vmem:[%s2668_s10 + $0x20] sm:$0xff]  ;;  %v2748_v54 = vld [vmem:[%s2668_s10 + $0x28] sm:$0xff] }
  0xb6   : > { %1921 = vmatprep.subr.bf16.mxu0 %v1920_v21  ;;  %v2753_v55 = vld [vmem:[%s2668_s10 + $0x30] sm:$0xff]  ;;  %v2758_v56 = vld [vmem:[%s2668_s10 + $0x38] sm:$0xff]  ;;  %v2763_v57 = vld [vmem:[%s2668_s10 + $0x40] sm:$0xff] }
  0xb7   : > { %v2768_v58 = vld [vmem:[%s2668_s10 + $0x48] sm:$0xff]  ;;  %v2773_v59 = vld [vmem:[%s2668_s10 + $0x50] sm:$0xff]  ;;  %v2778_v60 = vld [vmem:[%s2668_s10 + $0x58] sm:$0xff] }
  0xb8   : > { %3114 = vst [vmem:[#allocation26_spill] sm:$0xff] %v2773_v59  ;;  %3115 = vst [vmem:[#allocation27_spill] sm:$0xff] %v2778_v60  ;;  %v2783_v61 = vld [vmem:[%s2668_s10 + $0x60] sm:$0xff]  ;;  %v2788_v62 = vld [vmem:[%s2668_s10 + $0x68] sm:$0xff] }
  0xb9   : > { %1923 = vmatpush1.bf16.msra.mxu0 %v1922_v26  ;;  %3116 = vst [vmem:[#allocation28_spill] sm:$0xff] %v2783_v61  ;;  %3117 = vst [vmem:[#allocation29_spill] sm:$0xff] %v2788_v62  ;;  %v2793_v63 = vld [vmem:[%s2668_s10 + $0x70] sm:$0xff]  ;;  %v2798_v1 = vld [vmem:[%s2668_s10 + $0x78] sm:$0xff] }
  0xba   : > { %1925 = vmatprep.subr.bf16.mxu0 %v1924_v27  ;;  %3118 = vst [vmem:[#allocation30_spill] sm:$0xff] %v2793_v63  ;;  %3119 = vst [vmem:[#allocation31_spill] sm:$0xff] %v2798_v1  ;;  %v2802_v2 = vld [vmem:[#allocation3] sm:$0xff]  ;;  %v859_v4 = vld [vmem:[#allocation8 + $0x8] sm:$0xff] }
  0xbb   : > { %1716 = vmatprep.mubr.f32.mxu1 %v2802_v2  ;;  %v861_v5 = vld [vmem:[#allocation8 + $0x18] sm:$0xff]  ;;  %v858_v6 = vld [vmem:[#allocation8] sm:$0xff]  ;;  %v860_v9 = vld [vmem:[#allocation8 + $0x10] sm:$0xff] }
  0xbc   : > { %v2004_v8 = vpack.c.bf16 %v861_v5, %v859_v4  ;;  %v863_v10 = vld [vmem:[#allocation8 + $0x28] sm:$0xff]  ;;  %v865_v11 = vld [vmem:[#allocation8 + $0x38] sm:$0xff]  ;;  %v2006_v12 = vpack.c.bf16 %v860_v9, %v858_v6  ;;  %v862_v14 = vld [vmem:[#allocation8 + $0x20] sm:$0xff] }
  0xbd   : > { %1927 = vmatpush1.bf16.msra.mxu0 %v1926_v32  ;;  %v2008_v13 = vpack.c.bf16 %v865_v11, %v863_v10  ;;  %v864_v15 = vld [vmem:[#allocation8 + $0x30] sm:$0xff]  ;;  %v867_v16 = vld [vmem:[#allocation8 + $0x48] sm:$0xff]  ;;  %v869_v17 = vld [vmem:[#allocation8 + $0x58] sm:$0xff] }
  0xbe   : > { %1929 = vmatprep.subr.bf16.mxu0 %v1928_v33  ;;  %v2010_v19 = vpack.c.bf16 %v864_v15, %v862_v14  ;;  %v2012_v22 = vpack.c.bf16 %v869_v17, %v867_v16  ;;  %v866_v23 = vld [vmem:[#allocation8 + $0x40] sm:$0xff]  ;;  %v868_v24 = vld [vmem:[#allocation8 + $0x50] sm:$0xff]  ;;  %v871_v26 = vld [vmem:[#allocation8 + $0x68] sm:$0xff] }
  0xbf   : > { %v873_v27 = vld [vmem:[#allocation8 + $0x78] sm:$0xff]  ;;  %v2014_v29 = vpack.c.bf16 %v868_v24, %v866_v23  ;;  %v870_v32 = vld [vmem:[#allocation8 + $0x60] sm:$0xff]  ;;  %v872_v33 = vld [vmem:[#allocation8 + $0x70] sm:$0xff] }
  0xc0   : > { %v2016_v31 = vpack.c.bf16 %v873_v27, %v871_v26  ;;  %v875_v34 = vld [vmem:[#allocation8 + $0x88] sm:$0xff]  ;;  %v877_v35 = vld [vmem:[#allocation8 + $0x98] sm:$0xff]  ;;  %v2018_v37 = vpack.c.bf16 %v872_v33, %v870_v32  ;;  %v874_v41 = vld [vmem:[#allocation8 + $0x80] sm:$0xff] }
  0xc1   : > { %1931 = vmatpush1.bf16.msra.mxu0 %v1930_v38  ;;  %v2020_v40 = vpack.c.bf16 %v877_v35, %v875_v34  ;;  %v876_v42 = vld [vmem:[#allocation8 + $0x90] sm:$0xff]  ;;  %v878_v4 = vld [vmem:[#allocation8 + $0xa0] sm:$0xff]  ;;  %v883_v6 = vld [vmem:[#allocation8 + $0xc8] sm:$0xff] }
  0xc2   : > { %1933 = vmatprep.subr.bf16.mxu0 %v1932_v39  ;;  %v2022_v47 = vpack.c.bf16 %v876_v42, %v874_v41  ;;  %v880_v5 = vld [vmem:[#allocation8 + $0xb0] sm:$0xff]  ;;  %v887_v16 = vld [vmem:[#allocation8 + $0xe8] sm:$0xff]  ;;  %v889_v17 = vld [vmem:[#allocation8 + $0xf8] sm:$0xff] }
  0xc3   : > { %v2026_v9 = vpack.c.bf16 %v880_v5, %v878_v4  ;;  %v884_v14 = vld [vmem:[#allocation8 + $0xd0] sm:$0xff]  ;;  %v886_v23 = vld [vmem:[#allocation8 + $0xe0] sm:$0xff] }
  0xc4   : > { %v888_v24 = vld [vmem:[#allocation8 + $0xf0] sm:$0xff] }
  0xc5   : > { %1935 = vmatpush1.bf16.msra.mxu0 %v1934_v44  ;;  %v879_v44 = vld [vmem:[#allocation8 + $0xa8] sm:$0xff]  ;;  %v2034_v26 = vpack.c.bf16 %v888_v24, %v886_v23  ;;  %v2861_v23 = vld [vmem:[#allocation2] sm:$0xff] }
  0xc6   : > { %1937 = vmatprep.subr.bf16.mxu0 %v1936_v45  ;;  %v881_v45 = vld [vmem:[#allocation8 + $0xb8] sm:$0xff]  ;;  %v2865_v24 = vld [vmem:[#allocation2 + $0x8] sm:$0xff] }
  0xc9   : > { %1939 = vmatpush1.bf16.msra.mxu0 %v1938_v48 }
  0xca   : > { %2005 = vmatprep.subr.bf16.mxu0 %v2004_v8 }
  0xcc   : > { %449 = vmatmul.mubr.f32.vlgmr.msra.gmra.mrb[0].mxu0 %v2723_v49 }
  0xcd   : > { %454 = vmatprep.mubr.f32.mxu0 %v2445_v0  ;;  %2007 = vmatpush1.bf16.msra.mxu0 %v2006_v12 }
  0xce   : > { %2009 = vmatprep.subr.bf16.mxu0 %v2008_v13  ;;  %v882_v13 = vld [vmem:[#allocation8 + $0xc0] sm:$0xff] }
  0xd0   : > { %455 = vmatmul.mubr.f32.gmra.mrb[2].mxu0 %v2728_v50 }
  0xd1   : > { %460 = vmatprep.mubr.f32.mxu0 %v2445_v0  ;;  %2011 = vmatpush1.bf16.msra.mxu0 %v2010_v19  ;;  %v2030_v19 = vpack.c.bf16 %v884_v14, %v882_v13  ;;  %v2822_v13 = vld [vmem:[#allocation3 + $0x20] sm:$0xff]  ;;  %v2827_v14 = vld [vmem:[#allocation3 + $0x28] sm:$0xff] }
  0xd2   : > { %2013 = vmatprep.subr.bf16.mxu0 %v2012_v22  ;;  %v2032_v22 = vpack.c.bf16 %v889_v17, %v887_v16  ;;  %v2837_v16 = vld [vmem:[#allocation3 + $0x40] sm:$0xff]  ;;  %v2843_v17 = vld [vmem:[#allocation3 + $0x50] sm:$0xff] }
  0xd4   : > { %461 = vmatmul.mubr.f32.gmra.mrb[4].mxu0 %v2733_v51 }
  0xd5   : > { %466 = vmatprep.mubr.f32.mxu0 %v2445_v0  ;;  %2015 = vmatpush1.bf16.msra.mxu0 %v2014_v29 }
  0xd6   : > { %2017 = vmatprep.subr.bf16.mxu0 %v2016_v31 }
  0xd8   : > { %467 = vmatmul.mubr.f32.gmra.mrb[6].mxu0 %v2738_v52 }
  0xd9   : > { %472 = vmatprep.mubr.f32.mxu0 %v2445_v0  ;;  %2019 = vmatpush1.bf16.msra.mxu0 %v2018_v37 }
  0xda   : > { %2021 = vmatprep.subr.bf16.mxu0 %v2020_v40 }
  0xdc   : > { %473 = vmatmul.mubr.f32.gmra.mrb[8].mxu0 %v2743_v53 }
  0xdd   : > { %478 = vmatprep.mubr.f32.mxu0 %v2445_v0  ;;  %2023 = vmatpush1.bf16.msra.mxu0 %v2022_v47 }
  0xe0   : > { %479 = vmatmul.mubr.f32.gmra.mrb[10].mxu0 %v2748_v54 }
  0xe1   : > { %484 = vmatprep.mubr.f32.mxu0 %v2445_v0 }
  0xe4   : > { %485 = vmatmul.mubr.f32.gmra.mrb[12].mxu0 %v2753_v55 }
  0xe5   : > { %490 = vmatprep.mubr.f32.mxu0 %v2445_v0 }
  0xe8   : > { %491 = vmatmul.mubr.f32.gmra.mrb[14].mxu0 %v2758_v56 }
  0xe9   : > { %496 = vmatprep.mubr.f32.mxu0 %v2445_v0 }
  0xec   : > { %497 = vmatmul.mubr.f32.gmra.mrb[16].mxu0 %v2763_v57 }
  0xed   : > { %502 = vmatprep.mubr.f32.mxu0 %v2445_v0 }
  0xf0   : > { %503 = vmatmul.mubr.f32.gmra.mrb[18].mxu0 %v2768_v58 }
  0xf1   : > { %508 = vmatprep.mubr.f32.mxu0 %v2445_v0 }
  0xf4   : > { %509 = vmatmul.mubr.f32.gmra.mrb[20].mxu0 %v2773_v59 }
  0xf5   : > { %514 = vmatprep.mubr.f32.mxu0 %v2445_v0 }
  0xf8   : > { %515 = vmatmul.mubr.f32.gmra.mrb[22].mxu0 %v2778_v60 }
  0xf9   : > { %520 = vmatprep.mubr.f32.mxu0 %v2445_v0 }
  0xfc   : > { %521 = vmatmul.mubr.f32.gmra.mrb[24].mxu0 %v2783_v61 }
  0xfd   : > { %526 = vmatprep.mubr.f32.mxu0 %v2445_v0 }
 0x100   : > { %527 = vmatmul.mubr.f32.gmra.mrb[26].mxu0 %v2788_v62 }
 0x101   : > { %532 = vmatprep.mubr.f32.mxu0 %v2445_v0 }
 0x104   : > { %533 = vmatmul.mubr.f32.gmra.mrb[28].mxu0 %v2793_v63 }
 0x105   : > { %538 = vmatprep.mubr.f32.mxu0 %v2445_v0 }
 0x108   : > { %539 = vmatmul.mubr.f32.gmra.mrb[30].mxu0 %v2798_v1 }
 0x109   : > { %954 = vmatprep.mubr.f32.mxu0 %v2445_v0 }
 0x19f   : > { %v450_v3 = vpop.f32.mrb[0].mxu0 }
 0x1a0   : > { %v452_v7 = vpop.f32.mrb[1].mxu0 }
 0x1a3   : > { %v456_v18 = vpop.f32.mrb[2].mxu0 }
 0x1a4   : > { %v2805_v20 = vpack.c.bf16 %v456_v18, %v450_v3  ;;  %v458_v21 = vpop.f32.mrb[3].mxu0  ;;  %v2024_v3 = vpack.c.bf16 %v881_v45, %v879_v44 }
 0x1a5   : > { %v1940_v25 = vpack.c.bf16 %v458_v21, %v452_v7  ;;  %v885_v7 = vld [vmem:[#allocation8 + $0xd8] sm:$0xff] }
 0x1a6   : > { %2025 = vmatprep.subr.bf16.mxu0 %v2024_v3  ;;  %v2028_v12 = vpack.c.bf16 %v885_v7, %v883_v6 }
 0x1a7   : > { %v462_v28 = vpop.f32.mrb[4].mxu0  ;;  %1941 = vmatprep.subr.bf16.mxu1 %v1940_v25  ;;  %2027 = vmatpush1.bf16.msra.mxu0 %v2026_v9  ;;  %v2811_v9 = vld [vmem:[#allocation3 + $0x8] sm:$0xff] }
 0x1a8   : > { %v464_v30 = vpop.f32.mrb[5].mxu0  ;;  %1943 = vmatpush3.bf16.msra.mxu1 %v1940_v25  ;;  %2029 = vmatprep.subr.bf16.mxu0 %v2028_v12  ;;  %v2819_v12 = vld [vmem:[#allocation3 + $0x18] sm:$0xff] }
 0x1ab   : > { %v468_v36 = vpop.f32.mrb[6].mxu0  ;;  %2031 = vmatpush1.bf16.msra.mxu0 %v2030_v19  ;;  %v2853_v19 = vld [vmem:[#allocation3 + $0x68] sm:$0xff] }
 0x1ac   : > { %v2807_v38 = vpack.c.bf16 %v468_v36, %v462_v28  ;;  %v470_v39 = vpop.f32.mrb[7].mxu0  ;;  %2033 = vmatprep.subr.bf16.mxu0 %v2032_v22  ;;  %v2859_v22 = vld [vmem:[#allocation3 + $0x78] sm:$0xff] }
 0x1ad   : > { %v1944_v43 = vpack.c.bf16 %v470_v39, %v464_v30 }
 0x1af   : > { %v474_v46 = vpop.f32.mrb[8].mxu0  ;;  %1945 = vmatprep.subr.bf16.mxu1 %v1944_v43  ;;  %2035 = vmatpush1.bf16.msra.mxu0 %v2034_v26  ;;  %v2871_v26 = vld [vmem:[#allocation2 + $0x18] sm:$0xff] }
 0x1b0   : > { %v476_v48 = vpop.f32.mrb[9].mxu0  ;;  %1947 = vmatpush3.bf16.msra.mxu1 %v1944_v43 }
 0x1b3   : > { %v480_v8 = vpop.f32.mrb[10].mxu0 }
 0x1b4   : > { %v2809_v10 = vpack.c.bf16 %v480_v8, %v474_v46  ;;  %v482_v11 = vpop.f32.mrb[11].mxu0 }
 0x1b5   : > { %v1948_v15 = vpack.c.bf16 %v482_v11, %v476_v48  ;;  %v2814_v11 = vld [vmem:[#allocation3 + $0x10] sm:$0xff] }
 0x1b7   : > { %v486_v18 = vpop.f32.mrb[12].mxu0  ;;  %1949 = vmatprep.subr.bf16.mxu1 %v1948_v15 }
 0x1b8   : > { %v488_v21 = vpop.f32.mrb[13].mxu0  ;;  %1951 = vmatpush3.bf16.msra.mxu1 %v1948_v15  ;;  %v2830_v15 = vld [vmem:[#allocation3 + $0x30] sm:$0xff] }
 0x1bb   : > { %v492_v25 = vpop.f32.mrb[14].mxu0 }
 0x1bc   : > { %v1984_v27 = vpack.c.bf16 %v492_v25, %v486_v18  ;;  %v494_v28 = vpop.f32.mrb[15].mxu0  ;;  %v2849_v18 = vld [vmem:[#allocation3 + $0x60] sm:$0xff]  ;;  %v2867_v25 = vld [vmem:[#allocation2 + $0x10] sm:$0xff] }
 0x1bd   : > { %v1952_v29 = vpack.c.bf16 %v494_v28, %v488_v21  ;;  %v2855_v21 = vld [vmem:[#allocation3 + $0x70] sm:$0xff]  ;;  %v2877_v28 = vld [vmem:[#allocation2 + $0x28] sm:$0xff] }
 0x1bf   : > { %v498_v30 = vpop.f32.mrb[16].mxu0  ;;  %1953 = vmatprep.subr.bf16.mxu1 %v1952_v29 }
 0x1c0   : > { %v500_v31 = vpop.f32.mrb[17].mxu0  ;;  %1955 = vmatpush3.bf16.msra.mxu1 %v1952_v29  ;;  %v2879_v29 = vld [vmem:[#allocation2 + $0x30] sm:$0xff] }
 0x1c3   : > { %v504_v32 = vpop.f32.mrb[18].mxu0 }
 0x1c4   : > { %v1988_v33 = vpack.c.bf16 %v504_v32, %v498_v30  ;;  %v506_v34 = vpop.f32.mrb[19].mxu0  ;;  %v2883_v30 = vld [vmem:[#allocation2 + $0x38] sm:$0xff]  ;;  %v2889_v32 = vld [vmem:[#allocation2 + $0x48] sm:$0xff] }
 0x1c5   : > { %v1956_v35 = vpack.c.bf16 %v506_v34, %v500_v31  ;;  %v2885_v31 = vld [vmem:[#allocation2 + $0x40] sm:$0xff]  ;;  %v2895_v34 = vld [vmem:[#allocation2 + $0x58] sm:$0xff] }
 0x1c7   : > { %v510_v36 = vpop.f32.mrb[20].mxu0  ;;  %1957 = vmatprep.subr.bf16.mxu1 %v1956_v35 }
 0x1c8   : > { %v512_v37 = vpop.f32.mrb[21].mxu0  ;;  %1959 = vmatpush3.bf16.msra.mxu1 %v1956_v35  ;;  %v2897_v35 = vld [vmem:[#allocation2 + $0x60] sm:$0xff] }
 0x1cb   : > { %v516_v39 = vpop.f32.mrb[22].mxu0 }
 0x1cc   : > { %v1992_v40 = vpack.c.bf16 %v516_v39, %v510_v36  ;;  %v518_v41 = vpop.f32.mrb[23].mxu0  ;;  %v2901_v36 = vld [vmem:[#allocation2 + $0x68] sm:$0xff]  ;;  %v2907_v39 = vld [vmem:[#allocation2 + $0x78] sm:$0xff] }
 0x1cd   : > { %v1960_v42 = vpack.c.bf16 %v518_v41, %v512_v37  ;;  %v2903_v37 = vld [vmem:[#allocation2 + $0x70] sm:$0xff] }
 0x1cf   : > { %v522_v43 = vpop.f32.mrb[24].mxu0  ;;  %1961 = vmatprep.subr.bf16.mxu1 %v1960_v42 }
 0x1d0   : > { %v524_v44 = vpop.f32.mrb[25].mxu0  ;;  %1963 = vmatpush3.bf16.msra.mxu1 %v1960_v42 }
 0x1d3   : > { %v528_v45 = vpop.f32.mrb[26].mxu0 }
 0x1d4   : > { %v1996_v46 = vpack.c.bf16 %v528_v45, %v522_v43  ;;  %v530_v47 = vpop.f32.mrb[27].mxu0 }
 0x1d5   : > { %v1964_v48 = vpack.c.bf16 %v530_v47, %v524_v44 }
 0x1d7   : > { %v534_v3 = vpop.f32.mrb[28].mxu0  ;;  %1965 = vmatprep.subr.bf16.mxu1 %v1964_v48 }
 0x1d8   : > { %v536_v4 = vpop.f32.mrb[29].mxu0  ;;  %1967 = vmatpush3.bf16.msra.mxu1 %v1964_v48 }
 0x1db   : > { %v540_v5 = vpop.f32.mrb[30].mxu0 }
 0x1dc   : > { %v2000_v6 = vpack.c.bf16 %v540_v5, %v534_v3  ;;  %v542_v7 = vpop.f32.mrb[31].mxu0 }
 0x1dd   : > { %v1968_v8 = vpack.c.bf16 %v542_v7, %v536_v4 }
 0x1df   : > { %1969 = vmatprep.subr.bf16.mxu1 %v1968_v8 }
 0x1e0   : > { %1971 = vmatpush3.bf16.msra.mxu1 %v1968_v8 }
 0x1e1   : > { %1973 = vmatprep.subr.bf16.mxu1 %v2805_v20 }
 0x1e3   : > { %1717 = vmatmul.mubr.f32.vlgmr.msra.gmra.mrb[0].mxu1 %v2811_v9 }
 0x1e4   : > { %1975 = vmatpush3.bf16.msra.mxu1 %v2805_v20  ;;  %1719 = vmatprep.mubr.f32.mxu1 %v2814_v11  ;;  %v2835_v20 = vld [vmem:[#allocation3 + $0x38] sm:$0xff] }
 0x1e5   : > { %1977 = vmatprep.subr.bf16.mxu1 %v2807_v38 }
 0x1e7   : > { %1720 = vmatmul.mubr.f32.gmra.mrb[2].mxu1 %v2819_v12 }
 0x1e8   : > { %1979 = vmatpush3.bf16.msra.mxu1 %v2807_v38  ;;  %1722 = vmatprep.mubr.f32.mxu1 %v2822_v13  ;;  %v2841_v38 = vld [vmem:[#allocation3 + $0x48] sm:$0xff] }
 0x1e9   : > { %1981 = vmatprep.subr.bf16.mxu1 %v2809_v10 }
 0x1eb   : > { %1723 = vmatmul.mubr.f32.gmra.mrb[4].mxu1 %v2827_v14 }
 0x1ec   : > { %1983 = vmatpush3.bf16.msra.mxu1 %v2809_v10  ;;  %1725 = vmatprep.mubr.f32.mxu1 %v2830_v15  ;;  %v2847_v10 = vld [vmem:[#allocation3 + $0x58] sm:$0xff] }
 0x1ed   : > { %1985 = vmatprep.subr.bf16.mxu1 %v1984_v27 }
 0x1ef   : > { %1726 = vmatmul.mubr.f32.gmra.mrb[6].mxu1 %v2835_v20 }
 0x1f0   : > { %1987 = vmatpush3.bf16.msra.mxu1 %v1984_v27  ;;  %1728 = vmatprep.mubr.f32.mxu1 %v2837_v16  ;;  %v2873_v27 = vld [vmem:[#allocation2 + $0x20] sm:$0xff] }
 0x1f1   : > { %1989 = vmatprep.subr.bf16.mxu1 %v1988_v33 }
 0x1f3   : > { %1729 = vmatmul.mubr.f32.gmra.mrb[8].mxu1 %v2841_v38 }
 0x1f4   : > { %1991 = vmatpush3.bf16.msra.mxu1 %v1988_v33  ;;  %1731 = vmatprep.mubr.f32.mxu1 %v2843_v17  ;;  %v2891_v33 = vld [vmem:[#allocation2 + $0x50] sm:$0xff] }
 0x1f5   : > { %1993 = vmatprep.subr.bf16.mxu1 %v1992_v40 }
 0x1f7   : > { %1732 = vmatmul.mubr.f32.gmra.mrb[10].mxu1 %v2847_v10 }
 0x1f8   : > { %1995 = vmatpush3.bf16.msra.mxu1 %v1992_v40  ;;  %1734 = vmatprep.mubr.f32.mxu1 %v2849_v18  ;;  %v1545_v40 = vld [vmem:[%s3069_s3] ss:$0 sm:$0xff] }
 0x1f9   : > { %1997 = vmatprep.subr.bf16.mxu1 %v1996_v46 }
 0x1fb   : > { %1735 = vmatmul.mubr.f32.gmra.mrb[12].mxu1 %v2853_v19 }
 0x1fc   : > { %1999 = vmatpush3.bf16.msra.mxu1 %v1996_v46  ;;  %1737 = vmatprep.mubr.f32.mxu1 %v2855_v21 }
 0x1fd   : > { %2001 = vmatprep.subr.bf16.mxu1 %v2000_v6 }
 0x1ff   : > { %1738 = vmatmul.mubr.f32.gmra.mrb[14].mxu1 %v2859_v22 }
 0x200   : > { %2003 = vmatpush3.bf16.msra.mxu1 %v2000_v6  ;;  %1772 = vmatprep.mubr.f32.mxu1 %v2861_v23 }
 0x203   : > { %1773 = vmatmul.mubr.f32.vlgmr.msra.gmra.mrb[0].mxu1 %v2865_v24 }
 0x204   : > { %1775 = vmatprep.mubr.f32.mxu1 %v2867_v25 }
 0x207   : > { %1776 = vmatmul.mubr.f32.gmra.mrb[2].mxu1 %v2871_v26 }
 0x208   : > { %1778 = vmatprep.mubr.f32.mxu1 %v2873_v27 }
 0x20b   : > { %1779 = vmatmul.mubr.f32.gmra.mrb[4].mxu1 %v2877_v28 }
 0x20c   : > { %1781 = vmatprep.mubr.f32.mxu1 %v2879_v29 }
 0x20f   : > { %1782 = vmatmul.mubr.f32.gmra.mrb[6].mxu1 %v2883_v30 }
 0x210   : > { %1784 = vmatprep.mubr.f32.mxu1 %v2885_v31 }
 0x213   : > { %1785 = vmatmul.mubr.f32.gmra.mrb[8].mxu1 %v2889_v32 }
 0x214   : > { %1787 = vmatprep.mubr.f32.mxu1 %v2891_v33 }
 0x217   : > { %1788 = vmatmul.mubr.f32.gmra.mrb[10].mxu1 %v2895_v34 }
 0x218   : > { %1790 = vmatprep.mubr.f32.mxu1 %v2897_v35 }
 0x21b   : > { %1791 = vmatmul.mubr.f32.gmra.mrb[12].mxu1 %v2901_v36 }
 0x21c   : > { %1793 = vmatprep.mubr.f32.mxu1 %v2903_v37 }
 0x21f   : > { %1794 = vmatmul.mubr.f32.gmra.mrb[14].mxu1 %v2907_v39 }
 0x220   : > { %1828 = vmatprep.mubr.f32.mxu1 %v2802_v2 }
 0x2d6   : > { %v1774_v41 = vpop.f32.mrb[0].mxu1 }
 0x2d7   : > { %v756_v42 = vpop.f32.mrb[1].mxu1  ;;  %v843_v46 = vadd.f32 %v1774_v41, %v1545_v40 }
 0x2d8   : > { %v842_v43 = vadd.f32 %v1545_v40, %v756_v42 }
 0x2da   : > { %v1777_v44 = vpop.f32.mrb[2].mxu1  ;;  %955 = vmatmul.mubr.f32.vlgmr.msra.gmra.mrb[32].mxu0 %v842_v43 }
 0x2db   : > { %v766_v45 = vpop.f32.mrb[3].mxu1  ;;  %960 = vmatprep.mubr.f32.mxu0 %v2445_v0  ;;  %v845_v5 = vadd.f32 %v1777_v44, %v1545_v40 }
 0x2dc   : > { %v844_v3 = vadd.f32 %v1545_v40, %v766_v45 }
 0x2de   : > { %v1780_v47 = vpop.f32.mrb[4].mxu1  ;;  %961 = vmatmul.mubr.f32.gmra.mrb[34].mxu0 %v843_v46 }
 0x2df   : > { %v776_v48 = vpop.f32.mrb[5].mxu1  ;;  %966 = vmatprep.mubr.f32.mxu0 %v2445_v0  ;;  %v847_v43 = vadd.f32 %v1780_v47, %v1545_v40 }
 0x2e0   : > { %v846_v8 = vadd.f32 %v1545_v40, %v776_v48 }
 0x2e2   : > { %v1783_v2 = vpop.f32.mrb[6].mxu1  ;;  %967 = vmatmul.mubr.f32.gmra.mrb[36].mxu0 %v844_v3 }
 0x2e3   : > { %v786_v4 = vpop.f32.mrb[7].mxu1  ;;  %972 = vmatprep.mubr.f32.mxu0 %v2445_v0 }
 0x2e4   : > { %v848_v3 = vadd.f32 %v1545_v40, %v786_v4 }
 0x2e6   : > { %v1786_v6 = vpop.f32.mrb[8].mxu1  ;;  %973 = vmatmul.mubr.f32.gmra.mrb[38].mxu0 %v845_v5  ;;  %v849_v5 = vadd.f32 %v1783_v2, %v1545_v40 }
 0x2e7   : > { %v796_v7 = vpop.f32.mrb[9].mxu1  ;;  %978 = vmatprep.mubr.f32.mxu0 %v2445_v0  ;;  %v851_v47 = vadd.f32 %v1786_v6, %v1545_v40 }
 0x2e8   : > { %v850_v48 = vadd.f32 %v1545_v40, %v796_v7 }
 0x2ea   : > { %v1789_v42 = vpop.f32.mrb[10].mxu1  ;;  %979 = vmatmul.mubr.f32.gmra.mrb[40].mxu0 %v846_v8 }
 0x2eb   : > { %v806_v41 = vpop.f32.mrb[11].mxu1  ;;  %984 = vmatprep.mubr.f32.mxu0 %v2445_v0  ;;  %v853_v4 = vadd.f32 %v1789_v42, %v1545_v40 }
 0x2ec   : > { %v852_v8 = vadd.f32 %v1545_v40, %v806_v41 }
 0x2ee   : > { %v1792_v46 = vpop.f32.mrb[12].mxu1  ;;  %985 = vmatmul.mubr.f32.gmra.mrb[42].mxu0 %v847_v43 }
 0x2ef   : > { %v816_v45 = vpop.f32.mrb[13].mxu1  ;;  %990 = vmatprep.mubr.f32.mxu0 %v2445_v0  ;;  %v855_v7 = vadd.f32 %v1792_v46, %v1545_v40 }
 0x2f0   : > { %v854_v2 = vadd.f32 %v1545_v40, %v816_v45 }
 0x2f2   : > { %v1795_v63 = vpop.f32.mrb[14].mxu1  ;;  %991 = vmatmul.mubr.f32.gmra.mrb[44].mxu0 %v848_v3 }
 0x2f3   : > { %v826_v44 = vpop.f32.mrb[15].mxu1  ;;  %996 = vmatprep.mubr.f32.mxu0 %v2445_v0  ;;  %v857_v41 = vadd.f32 %v1795_v63, %v1545_v40 }
 0x2f4   : > { %v856_v6 = vadd.f32 %v1545_v40, %v826_v44 }
 0x2f6   : > { %997 = vmatmul.mubr.f32.gmra.mrb[46].mxu0 %v849_v5 }
 0x2f7   : > { %1002 = vmatprep.mubr.f32.mxu0 %v2445_v0 }
 0x2fa   : > { %1003 = vmatmul.mubr.f32.gmra.mrb[48].mxu0 %v850_v48 }
 0x2fb   : > { %1008 = vmatprep.mubr.f32.mxu0 %v2445_v0 }
 0x2fe   : > { %1009 = vmatmul.mubr.f32.gmra.mrb[50].mxu0 %v851_v47 }
 0x2ff   : > { %1014 = vmatprep.mubr.f32.mxu0 %v2445_v0 }
 0x302   : > { %1015 = vmatmul.mubr.f32.gmra.mrb[52].mxu0 %v852_v8 }
 0x303   : > { %1020 = vmatprep.mubr.f32.mxu0 %v2445_v0 }
 0x306   : > { %1021 = vmatmul.mubr.f32.gmra.mrb[54].mxu0 %v853_v4 }
 0x307   : > { %1026 = vmatprep.mubr.f32.mxu0 %v2445_v0 }
 0x30a   : > { %1027 = vmatmul.mubr.f32.gmra.mrb[56].mxu0 %v854_v2 }
 0x30b   : > { %1032 = vmatprep.mubr.f32.mxu0 %v2445_v0 }
 0x30e   : > { %1033 = vmatmul.mubr.f32.gmra.mrb[58].mxu0 %v855_v7 }
 0x30f   : > { %1038 = vmatprep.mubr.f32.mxu0 %v2445_v0 }
 0x312   : > { %1039 = vmatmul.mubr.f32.gmra.mrb[60].mxu0 %v856_v6 }
 0x313   : > { %1044 = vmatprep.mubr.f32.mxu0 %v2445_v0 }
 0x316   : > { %1045 = vmatmul.mubr.f32.gmra.mrb[62].mxu0 %v857_v41 }
 0x3ad   : > { %v956_v43 = vpop.f32.mrb[32].mxu0 }
 0x3ae   : > { %v958_v3 = vpop.f32.mrb[33].mxu0 }
 0x3b1   : > { %v962_v42 = vpop.f32.mrb[34].mxu0 }
 0x3b2   : > { %v2068_v5 = vpack.c.bf16 %v962_v42, %v956_v43  ;;  %v964_v48 = vpop.f32.mrb[35].mxu0 }
 0x3b3   : > { %v2036_v47 = vpack.c.bf16 %v964_v48, %v958_v3 }
 0x3b5   : > { %v968_v45 = vpop.f32.mrb[36].mxu0  ;;  %2037 = vmatprep.subr.bf16.mxu1 %v2036_v47 }
 0x3b6   : > { %v970_v8 = vpop.f32.mrb[37].mxu0  ;;  %2039 = vmatpush3.bf16.msra.mxu1 %v2036_v47 }
 0x3b9   : > { %v974_v46 = vpop.f32.mrb[38].mxu0 }
 0x3ba   : > { %v2072_v4 = vpack.c.bf16 %v974_v46, %v968_v45  ;;  %v976_v2 = vpop.f32.mrb[39].mxu0 }
 0x3bb   : > { %v2040_v7 = vpack.c.bf16 %v976_v2, %v970_v8 }
 0x3bd   : > { %v980_v44 = vpop.f32.mrb[40].mxu0  ;;  %2041 = vmatprep.subr.bf16.mxu1 %v2040_v7 }
 0x3be   : > { %v982_v6 = vpop.f32.mrb[41].mxu0  ;;  %2043 = vmatpush3.bf16.msra.mxu1 %v2040_v7 }
 0x3c1   : > { %v986_v0 = vpop.f32.mrb[42].mxu0 }
 0x3c2   : > { %v2076_v63 = vpack.c.bf16 %v986_v0, %v980_v44  ;;  %v988_v40 = vpop.f32.mrb[43].mxu0 }
 0x3c3   : > { %v2044_v41 = vpack.c.bf16 %v988_v40, %v982_v6 }
 0x3c5   : > { %v992_v1 = vpop.f32.mrb[44].mxu0  ;;  %2045 = vmatprep.subr.bf16.mxu1 %v2044_v41 }
 0x3c6   : > { %v994_v43 = vpop.f32.mrb[45].mxu0  ;;  %2047 = vmatpush3.bf16.msra.mxu1 %v2044_v41 }
 0x3c9   : > { %v998_v3 = vpop.f32.mrb[46].mxu0 }
 0x3ca   : > { %v2080_v42 = vpack.c.bf16 %v998_v3, %v992_v1  ;;  %v1000_v48 = vpop.f32.mrb[47].mxu0 }
 0x3cb   : > { %v2048_v47 = vpack.c.bf16 %v1000_v48, %v994_v43 }
 0x3cd   : > { %v1004_v61 = vpop.f32.mrb[48].mxu0  ;;  %2049 = vmatprep.subr.bf16.mxu1 %v2048_v47 }
 0x3ce   : > { %v1006_v45 = vpop.f32.mrb[49].mxu0  ;;  %2051 = vmatpush3.bf16.msra.mxu1 %v2048_v47 }
 0x3d1   : > { %v1010_v8 = vpop.f32.mrb[50].mxu0 }
 0x3d2   : > { %v2084_v46 = vpack.c.bf16 %v1010_v8, %v1004_v61  ;;  %v1012_v2 = vpop.f32.mrb[51].mxu0 }
 0x3d3   : > { %v2052_v7 = vpack.c.bf16 %v1012_v2, %v1006_v45 }
 0x3d5   : > { %v1016_v62 = vpop.f32.mrb[52].mxu0  ;;  %2053 = vmatprep.subr.bf16.mxu1 %v2052_v7 }
 0x3d6   : > { %v1018_v44 = vpop.f32.mrb[53].mxu0  ;;  %2055 = vmatpush3.bf16.msra.mxu1 %v2052_v7 }
 0x3d9   : > { %v1022_v6 = vpop.f32.mrb[54].mxu0 }
 0x3da   : > { %v2088_v0 = vpack.c.bf16 %v1022_v6, %v1016_v62  ;;  %v1024_v40 = vpop.f32.mrb[55].mxu0 }
 0x3db   : > { %v2056_v41 = vpack.c.bf16 %v1024_v40, %v1018_v44  ;;  %v3121_v44 = vld [vmem:[#allocation26_spill] sm:$0xff] }
 0x3dd   : > { %v1028_v59 = vpop.f32.mrb[56].mxu0  ;;  %2057 = vmatprep.subr.bf16.mxu1 %v2056_v41 }
 0x3de   : > { %v1030_v1 = vpop.f32.mrb[57].mxu0  ;;  %2059 = vmatpush3.bf16.msra.mxu1 %v2056_v41 }
 0x3e1   : > { %v1034_v43 = vpop.f32.mrb[58].mxu0 }
 0x3e2   : > { %v2092_v3 = vpack.c.bf16 %v1034_v43, %v1028_v59  ;;  %v1036_v48 = vpop.f32.mrb[59].mxu0  ;;  %v2963_v59 = vld [vmem:[%s3071_s5] ss:$0 sm:$0xff]  ;;  %v3122_v43 = vld [vmem:[#allocation29_spill] sm:$0xff] }
 0x3e3   : > { %v2060_v47 = vpack.c.bf16 %v1036_v48, %v1030_v1  ;;  %v3123_v48 = vld [vmem:[#allocation28_spill] sm:$0xff] }
 0x3e5   : > { %v1040_v60 = vpop.f32.mrb[60].mxu0  ;;  %2061 = vmatprep.subr.bf16.mxu1 %v2060_v47 }
 0x3e6   : > { %v1042_v61 = vpop.f32.mrb[61].mxu0  ;;  %2063 = vmatpush3.bf16.msra.mxu1 %v2060_v47 }
 0x3e9   : > { %v1046_v45 = vpop.f32.mrb[62].mxu0 }
 0x3ea   : > { %v2096_v8 = vpack.c.bf16 %v1046_v45, %v1040_v60  ;;  %v1048_v2 = vpop.f32.mrb[63].mxu0 }
 0x3eb   : > { %v2064_v7 = vpack.c.bf16 %v1048_v2, %v1042_v61 }
 0x3ed   : > { %2065 = vmatprep.subr.bf16.mxu1 %v2064_v7 }
 0x3ee   : > { %2067 = vmatpush3.bf16.msra.mxu1 %v2064_v7 }
 0x3ef   : > { %2069 = vmatprep.subr.bf16.mxu1 %v2068_v5 }
 0x3f1   : > { %1829 = vmatmul.mubr.f32.vlgmr.msra.gmra.mrb[16].mxu1 %v2811_v9 }
 0x3f2   : > { %2071 = vmatpush3.bf16.msra.mxu1 %v2068_v5  ;;  %1831 = vmatprep.mubr.f32.mxu1 %v2814_v11 }
 0x3f3   : > { %2073 = vmatprep.subr.bf16.mxu1 %v2072_v4 }
 0x3f5   : > { %1832 = vmatmul.mubr.f32.gmra.mrb[18].mxu1 %v2819_v12 }
 0x3f6   : > { %2075 = vmatpush3.bf16.msra.mxu1 %v2072_v4  ;;  %1834 = vmatprep.mubr.f32.mxu1 %v2822_v13 }
 0x3f7   : > { %2077 = vmatprep.subr.bf16.mxu1 %v2076_v63 }
 0x3f9   : > { %1835 = vmatmul.mubr.f32.gmra.mrb[20].mxu1 %v2827_v14 }
 0x3fa   : > { %2079 = vmatpush3.bf16.msra.mxu1 %v2076_v63  ;;  %1837 = vmatprep.mubr.f32.mxu1 %v2830_v15 }
 0x3fb   : > { %2081 = vmatprep.subr.bf16.mxu1 %v2080_v42 }
 0x3fd   : > { %1838 = vmatmul.mubr.f32.gmra.mrb[22].mxu1 %v2835_v20 }
 0x3fe   : > { %2083 = vmatpush3.bf16.msra.mxu1 %v2080_v42  ;;  %1840 = vmatprep.mubr.f32.mxu1 %v2837_v16  ;;  %v3120_v42 = vld [vmem:[#allocation27_spill] sm:$0xff] }
 0x3ff   : > { %2085 = vmatprep.subr.bf16.mxu1 %v2084_v46 }
 0x401   : > { %1841 = vmatmul.mubr.f32.gmra.mrb[24].mxu1 %v2841_v38 }
 0x402   : > { %2087 = vmatpush3.bf16.msra.mxu1 %v2084_v46  ;;  %1843 = vmatprep.mubr.f32.mxu1 %v2843_v17 }
 0x403   : > { %2089 = vmatprep.subr.bf16.mxu1 %v2088_v0 }
 0x405   : > { %1844 = vmatmul.mubr.f32.gmra.mrb[26].mxu1 %v2847_v10 }
 0x406   : > { %2091 = vmatpush3.bf16.msra.mxu1 %v2088_v0  ;;  %1846 = vmatprep.mubr.f32.mxu1 %v2849_v18 }
 0x407   : > { %2093 = vmatprep.subr.bf16.mxu1 %v2092_v3 }
 0x409   : > { %1847 = vmatmul.mubr.f32.gmra.mrb[28].mxu1 %v2853_v19 }
 0x40a   : > { %2095 = vmatpush3.bf16.msra.mxu1 %v2092_v3  ;;  %1849 = vmatprep.mubr.f32.mxu1 %v2855_v21 }
 0x40b   : > { %2097 = vmatprep.subr.bf16.mxu1 %v2096_v8 }
 0x40d   : > { %1850 = vmatmul.mubr.f32.gmra.mrb[30].mxu1 %v2859_v22 }
 0x40e   : > { %2099 = vmatpush3.bf16.msra.mxu1 %v2096_v8  ;;  %1884 = vmatprep.mubr.f32.mxu1 %v2861_v23 }
 0x411   : > { %1885 = vmatmul.mubr.f32.vlgmr.msra.gmra.mrb[16].mxu1 %v2865_v24 }
 0x412   : > { %1887 = vmatprep.mubr.f32.mxu1 %v2867_v25 }
 0x415   : > { %1888 = vmatmul.mubr.f32.gmra.mrb[18].mxu1 %v2871_v26 }
 0x416   : > { %1890 = vmatprep.mubr.f32.mxu1 %v2873_v27 }
 0x419   : > { %1891 = vmatmul.mubr.f32.gmra.mrb[20].mxu1 %v2877_v28 }
 0x41a   : > { %1893 = vmatprep.mubr.f32.mxu1 %v2879_v29 }
 0x41d   : > { %1894 = vmatmul.mubr.f32.gmra.mrb[22].mxu1 %v2883_v30 }
 0x41e   : > { %1896 = vmatprep.mubr.f32.mxu1 %v2885_v31 }
 0x421   : > { %1897 = vmatmul.mubr.f32.gmra.mrb[24].mxu1 %v2889_v32 }
 0x422   : > { %1899 = vmatprep.mubr.f32.mxu1 %v2891_v33 }
 0x425   : > { %1900 = vmatmul.mubr.f32.gmra.mrb[26].mxu1 %v2895_v34 }
 0x426   : > { %1902 = vmatprep.mubr.f32.mxu1 %v2897_v35 }
 0x429   : > { %1903 = vmatmul.mubr.f32.gmra.mrb[28].mxu1 %v2901_v36 }
 0x42a   : > { %1905 = vmatprep.mubr.f32.mxu1 %v2903_v37 }
 0x42d   : > { %1906 = vmatmul.mubr.f32.gmra.mrb[30].mxu1 %v2907_v39 }
 0x4e4   : > { %v1886_v60 = vpop.f32.mrb[16].mxu1 }
 0x4e5   : > { %v1349_v62 = vadd.f32 %v1886_v60, %v2963_v59  ;;  %v1262_v9 = vpop.f32.mrb[17].mxu1 }
 0x4e6   : > { %v1348_v11 = vadd.f32 %v2963_v59, %v1262_v9 }
 0x4e7   : > { %v1365_v12 = vadd.f32 %v1349_v62, %v2728_v50  ;;  %v3124_v62 = vld [vmem:[#allocation31_spill] sm:$0xff] }
 0x4e8   : > { %v1364_v13 = vadd.f32 %v1348_v11, %v2723_v49  ;;  %v1889_v14 = vpop.f32.mrb[18].mxu1  ;;  %v3125_v11 = vld [vmem:[#allocation30_spill] sm:$0xff] }
 0x4e9   : > { %v1381_v15 = vmul.f32 0.5, %v1365_v12  ;;  %v1351_v20 = vadd.f32 %v1889_v14, %v2963_v59  ;;  %v1272_v16 = vpop.f32.mrb[19].mxu1 }
 0x4ea   : > { %v1380_v38 = vmul.f32 0.5, %v1364_v13  ;;  %v1350_v17 = vadd.f32 %v2963_v59, %v1272_v16 }
 0x4eb   : > { %1397 = vst [vmem:[%s2711_s30 + $0x8] sm:$0xff] %v1381_v15  ;;  %v1367_v10 = vadd.f32 %v1351_v20, %v2738_v52 }
 0x4ec   : > { %1396 = vst [vmem:[%s2711_s30] sm:$0xff] %v1380_v38  ;;  %v1366_v18 = vadd.f32 %v1350_v17, %v2733_v51  ;;  %v1892_v19 = vpop.f32.mrb[20].mxu1 }
 0x4ed   : > { %v1383_v50 = vmul.f32 0.5, %v1367_v10  ;;  %v1353_v49 = vadd.f32 %v1892_v19, %v2963_v59  ;;  %v1282_v21 = vpop.f32.mrb[21].mxu1 }
 0x4ee   : > { %v1382_v22 = vmul.f32 0.5, %v1366_v18  ;;  %v1352_v23 = vadd.f32 %v2963_v59, %v1282_v21 }
 0x4ef   : > { %1399 = vst [vmem:[%s2711_s30 + $0x18] sm:$0xff] %v1383_v50  ;;  %v1369_v24 = vadd.f32 %v1353_v49, %v2748_v54 }
 0x4f0   : > { %1398 = vst [vmem:[%s2711_s30 + $0x10] sm:$0xff] %v1382_v22  ;;  %v1368_v25 = vadd.f32 %v1352_v23, %v2743_v53  ;;  %v1895_v52 = vpop.f32.mrb[22].mxu1 }
 0x4f1   : > { %v1385_v26 = vmul.f32 0.5, %v1369_v24  ;;  %v1355_v51 = vadd.f32 %v1895_v52, %v2963_v59  ;;  %v1292_v27 = vpop.f32.mrb[23].mxu1 }
 0x4f2   : > { %v1384_v28 = vmul.f32 0.5, %v1368_v25  ;;  %v1354_v29 = vadd.f32 %v2963_v59, %v1292_v27 }
 0x4f3   : > { %1401 = vst [vmem:[%s2711_s30 + $0x28] sm:$0xff] %v1385_v26  ;;  %v1371_v30 = vadd.f32 %v1355_v51, %v2758_v56 }
 0x4f4   : > { %1400 = vst [vmem:[%s2711_s30 + $0x20] sm:$0xff] %v1384_v28  ;;  %v1370_v31 = vadd.f32 %v1354_v29, %v2753_v55  ;;  %v1898_v54 = vpop.f32.mrb[24].mxu1 }
 0x4f5   : > { %v1387_v32 = vmul.f32 0.5, %v1371_v30  ;;  %v1357_v53 = vadd.f32 %v1898_v54, %v2963_v59  ;;  %v1302_v33 = vpop.f32.mrb[25].mxu1 }
 0x4f6   : > { %v1386_v34 = vmul.f32 0.5, %v1370_v31  ;;  %v1356_v35 = vadd.f32 %v2963_v59, %v1302_v33 }
 0x4f7   : > { %1403 = vst [vmem:[%s2711_s30 + $0x38] sm:$0xff] %v1387_v32  ;;  %v1373_v36 = vadd.f32 %v1357_v53, %v2768_v58 }
 0x4f8   : > { %1402 = vst [vmem:[%s2711_s30 + $0x30] sm:$0xff] %v1386_v34  ;;  %v1372_v37 = vadd.f32 %v1356_v35, %v2763_v57  ;;  %v1901_v56 = vpop.f32.mrb[26].mxu1 }
 0x4f9   : > { %v1389_v39 = vmul.f32 0.5, %v1373_v36  ;;  %v1359_v55 = vadd.f32 %v1901_v56, %v2963_v59  ;;  %v1312_v5 = vpop.f32.mrb[27].mxu1 }
 0x4fa   : > { %v1388_v4 = vmul.f32 0.5, %v1372_v37  ;;  %v1358_v63 = vadd.f32 %v2963_v59, %v1312_v5 }
 0x4fb   : > { %1405 = vst [vmem:[%s2711_s30 + $0x48] sm:$0xff] %v1389_v39  ;;  %v1375_v46 = vadd.f32 %v1359_v55, %v3120_v42 }
 0x4fc   : > { %1404 = vst [vmem:[%s2711_s30 + $0x40] sm:$0xff] %v1388_v4  ;;  %v1374_v6 = vadd.f32 %v1358_v63, %v3121_v44  ;;  %v1904_v58 = vpop.f32.mrb[28].mxu1 }
 0x4fd   : > { %v1391_v0 = vmul.f32 0.5, %v1375_v46  ;;  %v1361_v57 = vadd.f32 %v1904_v58, %v2963_v59  ;;  %v1322_v40 = vpop.f32.mrb[29].mxu1 }
 0x4fe   : > { %v1390_v41 = vmul.f32 0.5, %v1374_v6  ;;  %v1360_v1 = vadd.f32 %v2963_v59, %v1322_v40 }
 0x4ff   : > { %1407 = vst [vmem:[%s2711_s30 + $0x58] sm:$0xff] %v1391_v0  ;;  %v1377_v3 = vadd.f32 %v1361_v57, %v3122_v43 }
 0x500   : > { %1406 = vst [vmem:[%s2711_s30 + $0x50] sm:$0xff] %v1390_v41  ;;  %v1376_v47 = vadd.f32 %v1360_v1, %v3123_v48  ;;  %v1907_v61 = vpop.f32.mrb[30].mxu1 }
 0x501   : > { %v1393_v45 = vmul.f32 0.5, %v1377_v3  ;;  %v1363_v8 = vadd.f32 %v1907_v61, %v2963_v59  ;;  %v1332_v2 = vpop.f32.mrb[31].mxu1 }
 0x502   : > { %v1392_v7 = vmul.f32 0.5, %v1376_v47  ;;  %v1362_v60 = vadd.f32 %v2963_v59, %v1332_v2 }
 0x503   : > { %1409 = vst [vmem:[%s2711_s30 + $0x68] sm:$0xff] %v1393_v45  ;;  %v1379_v9 = vadd.f32 %v1363_v8, %v3124_v62 }
 0x504   : > { %1408 = vst [vmem:[%s2711_s30 + $0x60] sm:$0xff] %v1392_v7  ;;  %v1378_v12 = vadd.f32 %v1362_v60, %v3125_v11 }
 0x505   : > { %v1395_v13 = vmul.f32 0.5, %v1379_v9 }
 0x506   : > { %v1394_v59 = vmul.f32 0.5, %v1378_v12 }
 0x507   : > { %1411 = vst [vmem:[%s2711_s30 + $0x78] sm:$0xff] %v1395_v13 }
 0x508   : > { %1410 = vst [vmem:[%s2711_s30 + $0x70] sm:$0xff] %v1394_v59 }
 0x509   : > { %2365 = shalt.err (!%p2362_p8)
}
 0x50a   : > { %s2366_s23 = scalar_lea.hbm %s3016_s18, 2048  ;;  %s2370_s15 = scalar_lea.hbm %s3073_s7, 4096 }
 0x50b   : > { %p2367_p10 = scmp.ne.s32.totalorder %s3016_s18, %s2366_s23  ;;  %p2371_p7 = scmp.lt.u32.totalorder %s3016_s18, %s3073_s7 }
 0x50c   : > { %p2372_p2 = scmp.lt.u32.totalorder %s2370_s15, %s2366_s23  ;;  %p2374_p11 = scmp.lt.u32.totalorder %s2366_s23, %s3016_s18 }
 0x50d   : > { %p2368_p1 = pnand %p2367_p10, %p3126_p12 }
 0x50e   : > { %p2373_p5 = por %p2372_p2, %p2371_p7 }
 0x50f   : > { %p2369_p0 = pneg %p2368_p1 }
 0x510   : > { %p2375_p4 = por %p2374_p11, %p2373_p5 }
 0x512   : > { %p2376_p6 = pnand %p2375_p4, %p2369_p0 }
 0x514   : > { %2379 = shalt.err (!%p2376_p6)
}
 0x515   : > { %s2447_s22 = smov 128   ;;  %s2448_s19 = smov 8  }
 0x516   : > { %2147 = dma.vmem_to_hbm [thread:$0]  (%p3126_p12), %s3018_s29, 2048, %s3016_s18, %s3024_s28, %s2447_s22, %s2447_s22, %s2448_s19  }
 0x517 PF: > { %s1441_s16 = sand.u32 1, %s2422_s24   ;;  %p3127_p13 = scmp.ne.s32.totalorder %s3092_s14, 0 }
 0x518   : > { %p3128_p3 = scmp.ge.s32.totalorder %s2434_s27, 2  ;;  %s1442_s11 = scalar_lea.sflag [#allocation7], %s1441_s16 }
 0x51a   : > { %p2161_p9 = pnand %p3128_p3, %p3127_p13 }
 0x51c   : > { %2417 = dma.done.wait (!%p2161_p9), %s1442_s11, 2048  }
 0x51d   : > { %2419 = vsyncadd (!%p2161_p9), %s1442_s11, 4294965248  ;;  %s3129_s27 = sld [smem:[#allocation24_spill]]  ;;  %s3130_s20 = sld [smem:[#allocation25_spill]] }
 0x51e   : > { %s3131_s24 = smov %s2426_s25  ;;  %s3132_s25 = smov %s2430_s26 }
 0x523   : > { %p19_p8 = scmp.ge.s32.totalorder %s3129_s27, 4   ;;  %s3133_s26 = smov %s3130_s20 }
 0x525   :  { %21 = sbr.rel (!%p19_p8) target bundleno = 5 (0x5), region = 106 }
 0x52c   :  { %1447 = vsyncpa [#allocation6], 1 }
 0x52d   :  { %1449 = vsyncpa [#allocation6 + $0x1], 1 }
 0x52e   :  { %1450 = vsyncpa [#allocation9], 1 }
 0x52f   :  { %1451 = vsyncpa [#allocation7], 1 }
 0x530   :  { %1453 = vsyncpa [#allocation7 + $0x1], 1 }
 0x531   :  { %1454 = vsyncmov [#allocation4] }
 0x534   :  { %s1455_s13 = vpop.sfrf %1454 }
 0x535   :  { %p1552_p12 = scmp.ne.s32.totalorder %s1455_s13, 0 }
 0x537   :  { %1459 = shalt.err (%p1552_p12)  }
 0x538   :  { %1461 = vsyncmov [#allocation4 + $0x1] }
 0x53b   :  { %s1462_s14 = vpop.sfrf %1461 }
 0x53c   :  { %p1553_p10 = scmp.ne.s32.totalorder %s1462_s14, 0 }
 0x53e   :  { %1466 = shalt.err (%p1553_p10)  }

</bundles_post_ra>
